<compile_context>
chip_gen: v6e
topology: v6e:2x2x1
jax: 0.10.0
libtpu: 0.0.40
codegen_flags: <defaults>
</compile_context>

<pallas_src>
import functools

import numpy as np
import jax
import jax.numpy as jnp
from jax import lax
from jax.experimental import pallas as pl
from jax.experimental.pallas import tpu as pltpu


# ----------------------------------------------------------------------------
# Pallas kernel: 2-layer masked GRU (packed hidden) + fused linear head
# ----------------------------------------------------------------------------
def gru4rec_kernel(x2_ref, lens_ref, hp0_ref, gh00_ref, wih0_ref, wcomb_ref,
                   wlin_ref, out_ref, gi_ref, *, seq_len, hidden_size, h1_off):
    T = seq_len
    H = hidden_size
    O1 = h1_off
    B, G = lens_ref.shape                 # padded batch (8) x 128 lanes
    G2, G3, G4 = 2 * G, 3 * G, 4 * G

    # Layer-0 input projections for ALL timesteps in a single MXU dot, staged
    # through VMEM so only one [B, 3G] slice is live per unrolled step.
    gi_ref[...] = jnp.dot(x2_ref[...], wih0_ref[...],
                          preferred_element_type=jnp.float32)

    lane = lax.broadcasted_iota(jnp.int32, (B, G), 1)
    lane_h0 = lane < H                                 # layer-0 hidden lanes
    lane_h1 = (lane >= O1) & (lane < O1 + H)           # layer-1 hidden lanes
    lens = lens_ref[...]                               # per-row sequence length

    # Packed state [h0 | bias-1 | h1 | one_hot]; the bias / one-hot lanes are
    # never selected by the update masks, so they survive every step and drive
    # the folded bias rows / one-hot rows of the weight matrices.
    hp = hp0_ref[...]
    gh0 = gh00_ref[...]    # layer-0 recurrent projection for step 0 (constant)

    def _sigmoid(v):       # one EUP op per element (vs exp + divide)
        return 0.5 * jnp.tanh(0.5 * v) + 0.5

    # T is small & static -> unrolled time loop.
    for t in range(T):
        valid = lens > t

        # ---- layer 0 (lanes 0..H-1); gh0 came from last step's fused dot ---
        gi0 = gi_ref[t * B:(t + 1) * B, :]                       # [B, 3G]
        rz0 = _sigmoid(gi0[:, :G2] + gh0[:, :G2])                # r0 | z0
        n0 = jnp.tanh(gi0[:, G2:] + rz0[:, :G] * gh0[:, G2:])
        z0 = rz0[:, G:]
        hp = jnp.where(valid & lane_h0, (1.0 - z0) * n0 + z0 * hp, hp)

        # ---- ONE fused MXU dot: layer-1 gates + next step's gh0 ------------
        # output blocks: [r1 | z1 | n1_in | n1_hid | gh0_r | gh0_z | gh0_n]
        g = jnp.dot(hp.astype(jnp.bfloat16), wcomb_ref[...],
                    preferred_element_type=jnp.float32)          # [B, 7G]
        gh0 = g[:, G4:]

        # ---- layer 1 (lanes O1..O1+H-1) -------------------------------------
        rz1 = _sigmoid(g[:, :G2])
        n1 = jnp.tanh(g[:, G2:G3] + rz1[:, :G] * g[:, G3:G4])
        z1 = rz1[:, G:]
        hp = jnp.where(valid & lane_h1, (1.0 - z1) * n1 + z1 * hp, hp)

    # Head: sum(h0,h1) (duplicated weight rows), the linear bias (bias lane)
    # and the one-hot features (lanes 24..28) are all lanes of hp, so the
    # whole Linear(13, 146) is one lane-dense dot + one unmasked store.
    out_ref[...] = jnp.dot(hp.astype(jnp.bfloat16), wlin_ref[...],
                           preferred_element_type=jnp.float32)


def gru4rec_forward(x2, lens_bcast, hp0, gh00, wih0_aug, wcomb, wlin_packed,
                    *, seq_len, hidden_size, h1_off, out_pad):
    b_pad, g = lens_bcast.shape
    kernel = functools.partial(gru4rec_kernel, seq_len=seq_len,
                               hidden_size=hidden_size, h1_off=h1_off)
    vmem = pl.BlockSpec(memory_space=pltpu.MemorySpace.VMEM)
    # NOTE: at real batch sizes, tile the padded batch over a leading grid axis
    # with dimension_semantics=("parallel",) so both v7x TensorCores share it;
    # at B=4 the whole problem is one VMEM-resident tile and a grid would only
    # add pipeline bookkeeping + pointless double-buffering.
    return pl.pallas_call(
        kernel,
        out_shape=jax.ShapeDtypeStruct((b_pad, out_pad), jnp.float32),
        in_specs=[vmem] * 7,
        out_specs=vmem,
        scratch_shapes=[pltpu.VMEM((seq_len * b_pad, 3 * g), jnp.float32)],
    )(x2, lens_bcast, hp0, gh00, wih0_aug, wcomb, wlin_packed)


# ----------------------------------------------------------------------------
# Pure-JAX reference (PyTorch-layout weights) for a correctness check
# ----------------------------------------------------------------------------
def reference_forward(x_tbe, lens, torch_params, onehot):
    (w_ih0, w_hh0, b_ih0, b_hh0,
     w_ih1, w_hh1, b_ih1, b_hh1, w_lin, b_lin) = torch_params
    T, B, _ = x_tbe.shape
    H = w_hh0.shape[1]

    def cell(x, h, w_ih, w_hh, b_ih, b_hh):
        gi = x @ w_ih.T + b_ih
        gh = h @ w_hh.T + b_hh
        r = jax.nn.sigmoid(gi[:, :H] + gh[:, :H])
        z = jax.nn.sigmoid(gi[:, H:2 * H] + gh[:, H:2 * H])
        n = jnp.tanh(gi[:, 2 * H:] + r * gh[:, 2 * H:])
        return (1.0 - z) * n + z * h

    h0 = jnp.zeros((B, H), jnp.float32)
    h1 = jnp.zeros((B, H), jnp.float32)
    for t in range(T):
        m = (t < lens).astype(jnp.float32)[:, None]
        h0 = m * cell(x_tbe[t], h0, w_ih0, w_hh0, b_ih0, b_hh0) + (1 - m) * h0
        h1 = m * cell(h0, h1, w_ih1, w_hh1, b_ih1, b_hh1) + (1 - m) * h1
    concat = jnp.concatenate([h0 + h1, onehot], axis=1)
    return concat @ w_lin.T + b_lin


# ----------------------------------------------------------------------------
# Weight packing: PyTorch layout -> packed-lane, bias-folded kernel layout
# ----------------------------------------------------------------------------
def pack_params(torch_params, *, E, H, G, O1, OH, out_dim, out_pad):
    (w_ih0, w_hh0, b_ih0, b_hh0,
     w_ih1, w_hh1, b_ih1, b_hh1, w_lin, b_lin) = [
         np.asarray(p, np.float32) for p in torch_params]

    # ---- layer-0 input weight + combined-bias row, gate-blocked [E+1, 3G] --
    # gate blocks [r | z | n]; x carries a trailing ones column matched to the
    # bias row E, so (b_ih0+b_hh0) for r/z and b_ih0_n are folded in.
    wih0_aug = np.zeros((E + 1, 3 * G), np.float32)
    for g in range(3):
        wih0_aug[:E, g * G:g * G + H] = w_ih0[g * H:(g + 1) * H, :].T
    brz0 = b_ih0 + b_hh0
    wih0_aug[E, 0:H] = brz0[0:H]
    wih0_aug[E, G:G + H] = brz0[H:2 * H]
    wih0_aug[E, 2 * G:2 * G + H] = b_ih0[2 * H:3 * H]

    # ---- combined recurrent weight [G, 7G] over the packed hidden state ----
    # rows: 0..H-1 = h0 units, H = bias lane, O1..O1+H-1 = h1 units.
    # output blocks: [g1_r | g1_z | g1_nin | g1_nhid | gh0_r | gh0_z | gh0_n]
    wcomb = np.zeros((G, 7 * G), np.float32)
    for g in range(3):
        # h0 -> layer-1 input path (gate columns live at lane offset O1)
        wcomb[0:H, g * G + O1:g * G + O1 + H] = w_ih1[g * H:(g + 1) * H, :].T
        # h0 -> layer-0 recurrent path for the NEXT step (lanes 0..H-1)
        wcomb[0:H, (4 + g) * G:(4 + g) * G + H] = w_hh0[g * H:(g + 1) * H, :].T
    brz1 = b_ih1 + b_hh1
    wcomb[H, 0 * G + O1:0 * G + O1 + H] = brz1[0:H]
    wcomb[H, 1 * G + O1:1 * G + O1 + H] = brz1[H:2 * H]
    wcomb[H, 2 * G + O1:2 * G + O1 + H] = b_ih1[2 * H:3 * H]
    wcomb[H, 3 * G + O1:3 * G + O1 + H] = b_hh1[2 * H:3 * H]
    wcomb[H, 6 * G:6 * G + H] = b_hh0[2 * H:3 * H]
    # h1 -> layer-1 recurrent path (r, z, n_hidden)
    wcomb[O1:O1 + H, 0 * G + O1:0 * G + O1 + H] = w_hh1[0:H, :].T
    wcomb[O1:O1 + H, 1 * G + O1:1 * G + O1 + H] = w_hh1[H:2 * H, :].T
    wcomb[O1:O1 + H, 3 * G + O1:3 * G + O1 + H] = w_hh1[2 * H:3 * H, :].T

    # ---- packed head weight [G, out_pad]: Linear(13, 146) over hp lanes -----
    # h0 and h1 rows share the same weights (implements sum(hidden, dim=0)),
    # bias lane row carries b_lin, one-hot lanes carry the one-hot columns.
    n_oh = w_lin.shape[1] - H
    wlin_packed = np.zeros((G, out_pad), np.float32)
    wlin_packed[0:H, :out_dim] = w_lin[:, 0:H].T
    wlin_packed[O1:O1 + H, :out_dim] = w_lin[:, 0:H].T
    wlin_packed[H, :out_dim] = b_lin
    wlin_packed[OH:OH + n_oh, :out_dim] = w_lin[:, H:].T

    # ---- step-0 gh0 (h0_init has only the bias lane): just b_hh0_n ---------
    gh00_row = np.zeros((3 * G,), np.float32)
    gh00_row[2 * G:2 * G + H] = b_hh0[2 * H:3 * H]

    return wih0_aug, wcomb, wlin_packed, gh00_row


# ----------------------------------------------------------------------------
# Parameter init + input construction (glue)
# ----------------------------------------------------------------------------
if __name__ == "__main__":
    key = jax.random.PRNGKey(0)

    # feature_size = [n_sex, n_level, n_shop, n_cate, n_floor]
    feature_size = [4, 1, 20, 10, 6]
    E, H, out_dim = 4, 8, 146
    G = 128            # lane width (one per-gate block / one vreg row)
    O1 = 16            # lane offset of the layer-1 hidden block inside hp
    OH = 24            # lane offset of the one-hot block inside hp
    B = 4
    B_PAD = 8          # sublane-aligned batch
    OUT_PAD = 256      # lane-dense output width

    keys = jax.random.split(key, 16)

    # ---- embeddings (only the shop-id embedding feeds the GRU; the cate /
    #      floor embeddings in the torch forward are dead code) ----
    n_shop = feature_size[2]
    emb_shop = 0.1 * jax.random.normal(keys[0], (n_shop + 1, E), jnp.float32)
    emb_shop = emb_shop.at[n_shop].set(0.0)        # padding_idx row = 0

    # ---- GRU + linear weights in PyTorch layout ----
    def gru_layer(k, in_dim):
        k1, k2, k3, k4 = jax.random.split(k, 4)
        return (0.1 * jax.random.normal(k1, (3 * H, in_dim), jnp.float32),
                0.1 * jax.random.normal(k2, (3 * H, H), jnp.float32),
                0.1 * jax.random.normal(k3, (3 * H,), jnp.float32),
                0.1 * jax.random.normal(k4, (3 * H,), jnp.float32))

    w_ih0, w_hh0, b_ih0, b_hh0 = gru_layer(keys[1], E)
    w_ih1, w_hh1, b_ih1, b_hh1 = gru_layer(keys[2], H)
    w_lin = 0.1 * jax.random.normal(keys[3], (out_dim, H + 4 + 1), jnp.float32)
    b_lin = 0.1 * jax.random.normal(keys[4], (out_dim,), jnp.float32)
    torch_params = (w_ih0, w_hh0, b_ih0, b_hh0,
                    w_ih1, w_hh1, b_ih1, b_hh1, w_lin, b_lin)

    # ---- raw inputs ----
    cat_fea_sex = jnp.array([1, 0, 3, 2], dtype=jnp.int32)
    cat_fea_level_id = jnp.array([0, 0, 0, 0], dtype=jnp.int32)
    seq_lens = [3, 6, 2, 5]
    shop_seqs = []
    for i, L in enumerate(seq_lens):
        ids = jax.random.randint(keys[5 + i], (L,), 0, n_shop)
        shop_seqs.append(np.asarray(ids, dtype=np.int32))

    # pad_sequence() in the module: sort by length (desc, stable), pad with
    # padding_idx.  NOTE: the cat features keep their original order (the
    # module does not re-align them) — reproduced faithfully here.
    order = sorted(range(B), key=lambda i: len(shop_seqs[i]), reverse=True)
    sorted_seqs = [shop_seqs[i] for i in order]
    lens_sorted = np.array([len(s) for s in sorted_seqs], dtype=np.int32)
    T = int(lens_sorted.max())
    padded = np.full((B, T), n_shop, dtype=np.int32)
    for b, s in enumerate(sorted_seqs):
        padded[b, :len(s)] = s

    # embed + go time-major: [B, T] -> [T, B, E]
    x_emb = np.asarray(jnp.take(emb_shop, jnp.asarray(padded), axis=0))
    x_tbe = np.transpose(x_emb, (1, 0, 2)).astype(np.float32)

    # one_hot(sex, 4) ++ one_hot(level_id, 1) -> [B, 5]
    onehot_b5 = np.concatenate(
        [np.asarray(jax.nn.one_hot(cat_fea_sex, 4, dtype=jnp.float32)),
         np.asarray(jax.nn.one_hot(cat_fea_level_id, 1, dtype=jnp.float32))],
        axis=1)

    # ---- kernel-layout inputs ----
    # flattened time-major embeddings + ones bias column, batch padded to 8
    x2 = np.zeros((T * B_PAD, E + 1), np.float32)
    x2[:, E] = 1.0
    for t in range(T):
        x2[t * B_PAD:t * B_PAD + B, :E] = x_tbe[t]

    # per-row sequence length broadcast over lanes (pad rows stay 0 -> frozen)
    lens_bcast = np.zeros((B_PAD, G), np.int32)
    lens_bcast[:B, :] = lens_sorted[:, None]

    # packed initial state hp = [h0(0..7) | bias(8) | h1(16..23) | onehot(24..28)]
    # pad rows are all-zero (no bias lane) so their outputs are exactly zero.
    hp0 = np.zeros((B_PAD, G), np.float32)
    hp0[:B, H] = 1.0
    hp0[:B, OH:OH + onehot_b5.shape[1]] = onehot_b5

    wih0_aug, wcomb, wlin_packed, gh00_row = pack_params(
        torch_params, E=E, H=H, G=G, O1=O1, OH=OH,
        out_dim=out_dim, out_pad=OUT_PAD)
    gh00 = np.tile(gh00_row[None, :], (B_PAD, 1))

    # ---- run kernel (big weights in bf16: MXU-native, halves weight DMA) ---
    out_full = gru4rec_forward(
        jnp.asarray(x2),
        jnp.asarray(lens_bcast),
        jnp.asarray(hp0),
        jnp.asarray(gh00),
        jnp.asarray(wih0_aug),
        jnp.asarray(wcomb, dtype=jnp.bfloat16),
        jnp.asarray(wlin_packed, dtype=jnp.bfloat16),
        seq_len=T, hidden_size=H, h1_off=O1, out_pad=OUT_PAD)
    out_full = jax.block_until_ready(out_full)
    out = np.asarray(out_full)[:B, :out_dim]     # strip sublane/lane padding

    # ---- correctness vs pure-JAX f32 reference (bf16 weights -> loose tol) --
    ref = reference_forward(jnp.asarray(x_tbe), jnp.asarray(lens_sorted),
                            torch_params, jnp.asarray(onehot_b5))
    np.testing.assert_allclose(out, np.asarray(ref), rtol=2e-2, atol=2e-2)
    assert out.shape == (B, out_dim)
    print("KERNEL_OK")
</pallas_src>

<mosaic_0001>
module attributes {stable_mosaic.version = 11 : i64} {
  func.func @gru4rec_kernel(%arg0: memref<48x5xf32, #tpu.memory_space<vmem>>, %arg1: memref<8x128xi32, #tpu.memory_space<vmem>>, %arg2: memref<8x128xf32, #tpu.memory_space<vmem>>, %arg3: memref<8x384xf32, #tpu.memory_space<vmem>>, %arg4: memref<5x384xf32, #tpu.memory_space<vmem>>, %arg5: memref<128x896xbf16, #tpu.memory_space<vmem>>, %arg6: memref<128x256xbf16, #tpu.memory_space<vmem>>, %arg7: memref<8x256xf32, #tpu.memory_space<vmem>>, %arg8: memref<48x384xf32, #tpu.memory_space<vmem>>) attributes {dimension_semantics = [], scalar_prefetch = 0 : i64, scratch_operands = 1 : i64, tpu.core_type = #tpu.core_type<tc>} {
    %c0 = arith.constant 0 : index
    %c0_0 = arith.constant 0 : index
    %0 = vector.load %arg0[%c0, %c0_0] : memref<48x5xf32, #tpu.memory_space<vmem>>, vector<48x5xf32>
    %c0_1 = arith.constant 0 : index
    %c0_2 = arith.constant 0 : index
    %1 = vector.load %arg4[%c0_1, %c0_2] : memref<5x384xf32, #tpu.memory_space<vmem>>, vector<5x384xf32>
    %cst = arith.constant dense<0.000000e+00> : vector<48x384xf32>
    %2 = tpu.matmul %0, %1, %cst {dimension_numbers = #tpu.dot_dimension_numbers<[1], [0], [0], [1], [0, 0, 1, 1], [], []>} : vector<48x5xf32>, vector<5x384xf32>, vector<48x384xf32> -> vector<48x384xf32>
    %c0_3 = arith.constant 0 : index
    %c0_4 = arith.constant 0 : index
    %3 = vector.load %arg8[%c0_3, %c0_4] : memref<48x384xf32, #tpu.memory_space<vmem>>, vector<48x384xf32>
    tpu.vector_store %arg8[%c0_3, %c0_4], %2 {strides = array<i32>} : memref<48x384xf32, #tpu.memory_space<vmem>>, vector<48x384xf32>,
    %4 = tpu.iota {dimensions = array<i32: 1>} : vector<8x128xi32>
    %c8_i32 = arith.constant 8 : i32
    %5 = vector.broadcast %c8_i32 : i32 to vector<8x128xi32>
    %6 = arith.cmpi slt, %4, %5 : vector<8x128xi32>
    %c16_i32 = arith.constant 16 : i32
    %7 = vector.broadcast %c16_i32 : i32 to vector<8x128xi32>
    %8 = arith.cmpi sge, %4, %7 : vector<8x128xi32>
    %c24_i32 = arith.constant 24 : i32
    %9 = vector.broadcast %c24_i32 : i32 to vector<8x128xi32>
    %10 = arith.cmpi slt, %4, %9 : vector<8x128xi32>
    %11 = arith.andi %8, %10 : vector<8x128xi1>
    %c0_5 = arith.constant 0 : index
    %c0_6 = arith.constant 0 : index
    %12 = vector.load %arg1[%c0_5, %c0_6] : memref<8x128xi32, #tpu.memory_space<vmem>>, vector<8x128xi32>
    %c0_7 = arith.constant 0 : index
    %c0_8 = arith.constant 0 : index
    %13 = vector.load %arg2[%c0_7, %c0_8] : memref<8x128xf32, #tpu.memory_space<vmem>>, vector<8x128xf32>
    %c0_9 = arith.constant 0 : index
    %c0_10 = arith.constant 0 : index
    %14 = vector.load %arg3[%c0_9, %c0_10] : memref<8x384xf32, #tpu.memory_space<vmem>>, vector<8x384xf32>
    %c0_i32 = arith.constant 0 : i32
    %15 = vector.broadcast %c0_i32 : i32 to vector<8x128xi32>
    %16 = arith.cmpi sgt, %12, %15 : vector<8x128xi32>
    %c0_11 = arith.constant 0 : index
    %c0_12 = arith.constant 0 : index
    %17 = vector.load %arg8[%c0_11, %c0_12] : memref<48x384xf32, #tpu.memory_space<vmem>>, vector<8x384xf32>
    %18 = vector.extract_strided_slice %17 {offsets = [0, 0], sizes = [8, 256], strides = [1, 1]} : vector<8x384xf32> to vector<8x256xf32>
    %19 = vector.extract_strided_slice %14 {offsets = [0, 0], sizes = [8, 256], strides = [1, 1]} : vector<8x384xf32> to vector<8x256xf32>
    %20 = arith.addf %18, %19 : vector<8x256xf32>
    %cst_13 = arith.constant 5.000000e-01 : f32
    %21 = vector.broadcast %cst_13 : f32 to vector<8x256xf32>
    %22 = arith.mulf %21, %20 : vector<8x256xf32>
    %23 = math.tanh %22 : vector<8x256xf32>
    %cst_14 = arith.constant 5.000000e-01 : f32
    %24 = vector.broadcast %cst_14 : f32 to vector<8x256xf32>
    %25 = arith.mulf %24, %23 : vector<8x256xf32>
    %cst_15 = arith.constant 5.000000e-01 : f32
    %26 = vector.broadcast %cst_15 : f32 to vector<8x256xf32>
    %27 = arith.addf %25, %26 : vector<8x256xf32>
    %28 = vector.extract_strided_slice %17 {offsets = [0, 256], sizes = [8, 128], strides = [1, 1]} : vector<8x384xf32> to vector<8x128xf32>
    %29 = vector.extract_strided_slice %27 {offsets = [0, 0], sizes = [8, 128], strides = [1, 1]} : vector<8x256xf32> to vector<8x128xf32>
    %30 = vector.extract_strided_slice %14 {offsets = [0, 256], sizes = [8, 128], strides = [1, 1]} : vector<8x384xf32> to vector<8x128xf32>
    %31 = arith.mulf %29, %30 : vector<8x128xf32>
    %32 = arith.addf %28, %31 : vector<8x128xf32>
    %33 = math.tanh %32 : vector<8x128xf32>
    %34 = vector.extract_strided_slice %27 {offsets = [0, 128], sizes = [8, 128], strides = [1, 1]} : vector<8x256xf32> to vector<8x128xf32>
    %35 = arith.andi %16, %6 : vector<8x128xi1>
    %cst_16 = arith.constant 1.000000e+00 : f32
    %36 = vector.broadcast %cst_16 : f32 to vector<8x128xf32>
    %37 = arith.subf %36, %34 : vector<8x128xf32>
    %38 = arith.mulf %37, %33 : vector<8x128xf32>
    %39 = arith.mulf %34, %13 : vector<8x128xf32>
    %40 = arith.addf %38, %39 : vector<8x128xf32>
    %41 = arith.select %35, %40, %13 : vector<8x128xi1>, vector<8x128xf32>
    %42 = arith.truncf %41 : vector<8x128xf32> to vector<8x128xbf16>
    %c0_17 = arith.constant 0 : index
    %c0_18 = arith.constant 0 : index
    %43 = vector.load %arg5[%c0_17, %c0_18] : memref<128x896xbf16, #tpu.memory_space<vmem>>, vector<128x896xbf16>
    %cst_19 = arith.constant dense<0.000000e+00> : vector<8x896xf32>
    %44 = tpu.matmul %42, %43, %cst_19 {dimension_numbers = #tpu.dot_dimension_numbers<[1], [0], [0], [1], [0, 0, 1, 1], [], []>} : vector<8x128xbf16>, vector<128x896xbf16>, vector<8x896xf32> -> vector<8x896xf32>
    %45 = vector.extract_strided_slice %44 {offsets = [0, 512], sizes = [8, 384], strides = [1, 1]} : vector<8x896xf32> to vector<8x384xf32>
    %46 = vector.extract_strided_slice %44 {offsets = [0, 0], sizes = [8, 256], strides = [1, 1]} : vector<8x896xf32> to vector<8x256xf32>
    %cst_20 = arith.constant 5.000000e-01 : f32
    %47 = vector.broadcast %cst_20 : f32 to vector<8x256xf32>
    %48 = arith.mulf %47, %46 : vector<8x256xf32>
    %49 = math.tanh %48 : vector<8x256xf32>
    %cst_21 = arith.constant 5.000000e-01 : f32
    %50 = vector.broadcast %cst_21 : f32 to vector<8x256xf32>
    %51 = arith.mulf %50, %49 : vector<8x256xf32>
    %cst_22 = arith.constant 5.000000e-01 : f32
    %52 = vector.broadcast %cst_22 : f32 to vector<8x256xf32>
    %53 = arith.addf %51, %52 : vector<8x256xf32>
    %54 = vector.extract_strided_slice %44 {offsets = [0, 256], sizes = [8, 128], strides = [1, 1]} : vector<8x896xf32> to vector<8x128xf32>
    %55 = vector.extract_strided_slice %53 {offsets = [0, 0], sizes = [8, 128], strides = [1, 1]} : vector<8x256xf32> to vector<8x128xf32>
    %56 = vector.extract_strided_slice %44 {offsets = [0, 384], sizes = [8, 128], strides = [1, 1]} : vector<8x896xf32> to vector<8x128xf32>
    %57 = arith.mulf %55, %56 : vector<8x128xf32>
    %58 = arith.addf %54, %57 : vector<8x128xf32>
    %59 = math.tanh %58 : vector<8x128xf32>
    %60 = vector.extract_strided_slice %53 {offsets = [0, 128], sizes = [8, 128], strides = [1, 1]} : vector<8x256xf32> to vector<8x128xf32>
    %61 = arith.andi %16, %11 : vector<8x128xi1>
    %cst_23 = arith.constant 1.000000e+00 : f32
    %62 = vector.broadcast %cst_23 : f32 to vector<8x128xf32>
    %63 = arith.subf %62, %60 : vector<8x128xf32>
    %64 = arith.mulf %63, %59 : vector<8x128xf32>
    %65 = arith.mulf %60, %41 : vector<8x128xf32>
    %66 = arith.addf %64, %65 : vector<8x128xf32>
    %67 = arith.select %61, %66, %41 : vector<8x128xi1>, vector<8x128xf32>
    %c1_i32 = arith.constant 1 : i32
    %68 = vector.broadcast %c1_i32 : i32 to vector<8x128xi32>
    %69 = arith.cmpi sgt, %12, %68 : vector<8x128xi32>
    %c8 = arith.constant 8 : index
    %c0_24 = arith.constant 0 : index
    %70 = vector.load %arg8[%c8, %c0_24] : memref<48x384xf32, #tpu.memory_space<vmem>>, vector<8x384xf32>
    %71 = vector.extract_strided_slice %70 {offsets = [0, 0], sizes = [8, 256], strides = [1, 1]} : vector<8x384xf32> to vector<8x256xf32>
    %72 = vector.extract_strided_slice %45 {offsets = [0, 0], sizes = [8, 256], strides = [1, 1]} : vector<8x384xf32> to vector<8x256xf32>
    %73 = arith.addf %71, %72 : vector<8x256xf32>
    %cst_25 = arith.constant 5.000000e-01 : f32
    %74 = vector.broadcast %cst_25 : f32 to vector<8x256xf32>
    %75 = arith.mulf %74, %73 : vector<8x256xf32>
    %76 = math.tanh %75 : vector<8x256xf32>
    %cst_26 = arith.constant 5.000000e-01 : f32
    %77 = vector.broadcast %cst_26 : f32 to vector<8x256xf32>
    %78 = arith.mulf %77, %76 : vector<8x256xf32>
    %cst_27 = arith.constant 5.000000e-01 : f32
    %79 = vector.broadcast %cst_27 : f32 to vector<8x256xf32>
    %80 = arith.addf %78, %79 : vector<8x256xf32>
    %81 = vector.extract_strided_slice %70 {offsets = [0, 256], sizes = [8, 128], strides = [1, 1]} : vector<8x384xf32> to vector<8x128xf32>
    %82 = vector.extract_strided_slice %80 {offsets = [0, 0], sizes = [8, 128], strides = [1, 1]} : vector<8x256xf32> to vector<8x128xf32>
    %83 = vector.extract_strided_slice %45 {offsets = [0, 256], sizes = [8, 128], strides = [1, 1]} : vector<8x384xf32> to vector<8x128xf32>
    %84 = arith.mulf %82, %83 : vector<8x128xf32>
    %85 = arith.addf %81, %84 : vector<8x128xf32>
    %86 = math.tanh %85 : vector<8x128xf32>
    %87 = vector.extract_strided_slice %80 {offsets = [0, 128], sizes = [8, 128], strides = [1, 1]} : vector<8x256xf32> to vector<8x128xf32>
    %88 = arith.andi %69, %6 : vector<8x128xi1>
    %cst_28 = arith.constant 1.000000e+00 : f32
    %89 = vector.broadcast %cst_28 : f32 to vector<8x128xf32>
    %90 = arith.subf %89, %87 : vector<8x128xf32>
    %91 = arith.mulf %90, %86 : vector<8x128xf32>
    %92 = arith.mulf %87, %67 : vector<8x128xf32>
    %93 = arith.addf %91, %92 : vector<8x128xf32>
    %94 = arith.select %88, %93, %67 : vector<8x128xi1>, vector<8x128xf32>
    %95 = arith.truncf %94 : vector<8x128xf32> to vector<8x128xbf16>
    %c0_29 = arith.constant 0 : index
    %c0_30 = arith.constant 0 : index
    %96 = vector.load %arg5[%c0_29, %c0_30] : memref<128x896xbf16, #tpu.memory_space<vmem>>, vector<128x896xbf16>
    %cst_31 = arith.constant dense<0.000000e+00> : vector<8x896xf32>
    %97 = tpu.matmul %95, %96, %cst_31 {dimension_numbers = #tpu.dot_dimension_numbers<[1], [0], [0], [1], [0, 0, 1, 1], [], []>} : vector<8x128xbf16>, vector<128x896xbf16>, vector<8x896xf32> -> vector<8x896xf32>
    %98 = vector.extract_strided_slice %97 {offsets = [0, 512], sizes = [8, 384], strides = [1, 1]} : vector<8x896xf32> to vector<8x384xf32>
    %99 = vector.extract_strided_slice %97 {offsets = [0, 0], sizes = [8, 256], strides = [1, 1]} : vector<8x896xf32> to vector<8x256xf32>
    %cst_32 = arith.constant 5.000000e-01 : f32
    %100 = vector.broadcast %cst_32 : f32 to vector<8x256xf32>
    %101 = arith.mulf %100, %99 : vector<8x256xf32>
    %102 = math.tanh %101 : vector<8x256xf32>
    %cst_33 = arith.constant 5.000000e-01 : f32
    %103 = vector.broadcast %cst_33 : f32 to vector<8x256xf32>
    %104 = arith.mulf %103, %102 : vector<8x256xf32>
    %cst_34 = arith.constant 5.000000e-01 : f32
    %105 = vector.broadcast %cst_34 : f32 to vector<8x256xf32>
    %106 = arith.addf %104, %105 : vector<8x256xf32>
    %107 = vector.extract_strided_slice %97 {offsets = [0, 256], sizes = [8, 128], strides = [1, 1]} : vector<8x896xf32> to vector<8x128xf32>
    %108 = vector.extract_strided_slice %106 {offsets = [0, 0], sizes = [8, 128], strides = [1, 1]} : vector<8x256xf32> to vector<8x128xf32>
    %109 = vector.extract_strided_slice %97 {offsets = [0, 384], sizes = [8, 128], strides = [1, 1]} : vector<8x896xf32> to vector<8x128xf32>
    %110 = arith.mulf %108, %109 : vector<8x128xf32>
    %111 = arith.addf %107, %110 : vector<8x128xf32>
    %112 = math.tanh %111 : vector<8x128xf32>
    %113 = vector.extract_strided_slice %106 {offsets = [0, 128], sizes = [8, 128], strides = [1, 1]} : vector<8x256xf32> to vector<8x128xf32>
    %114 = arith.andi %69, %11 : vector<8x128xi1>
    %cst_35 = arith.constant 1.000000e+00 : f32
    %115 = vector.broadcast %cst_35 : f32 to vector<8x128xf32>
    %116 = arith.subf %115, %113 : vector<8x128xf32>
    %117 = arith.mulf %116, %112 : vector<8x128xf32>
    %118 = arith.mulf %113, %94 : vector<8x128xf32>
    %119 = arith.addf %117, %118 : vector<8x128xf32>
    %120 = arith.select %114, %119, %94 : vector<8x128xi1>, vector<8x128xf32>
    %c2_i32 = arith.constant 2 : i32
    %121 = vector.broadcast %c2_i32 : i32 to vector<8x128xi32>
    %122 = arith.cmpi sgt, %12, %121 : vector<8x128xi32>
    %c16 = arith.constant 16 : index
    %c0_36 = arith.constant 0 : index
    %123 = vector.load %arg8[%c16, %c0_36] : memref<48x384xf32, #tpu.memory_space<vmem>>, vector<8x384xf32>
    %124 = vector.extract_strided_slice %123 {offsets = [0, 0], sizes = [8, 256], strides = [1, 1]} : vector<8x384xf32> to vector<8x256xf32>
    %125 = vector.extract_strided_slice %98 {offsets = [0, 0], sizes = [8, 256], strides = [1, 1]} : vector<8x384xf32> to vector<8x256xf32>
    %126 = arith.addf %124, %125 : vector<8x256xf32>
    %cst_37 = arith.constant 5.000000e-01 : f32
    %127 = vector.broadcast %cst_37 : f32 to vector<8x256xf32>
    %128 = arith.mulf %127, %126 : vector<8x256xf32>
    %129 = math.tanh %128 : vector<8x256xf32>
    %cst_38 = arith.constant 5.000000e-01 : f32
    %130 = vector.broadcast %cst_38 : f32 to vector<8x256xf32>
    %131 = arith.mulf %130, %129 : vector<8x256xf32>
    %cst_39 = arith.constant 5.000000e-01 : f32
    %132 = vector.broadcast %cst_39 : f32 to vector<8x256xf32>
    %133 = arith.addf %131, %132 : vector<8x256xf32>
    %134 = vector.extract_strided_slice %123 {offsets = [0, 256], sizes = [8, 128], strides = [1, 1]} : vector<8x384xf32> to vector<8x128xf32>
    %135 = vector.extract_strided_slice %133 {offsets = [0, 0], sizes = [8, 128], strides = [1, 1]} : vector<8x256xf32> to vector<8x128xf32>
    %136 = vector.extract_strided_slice %98 {offsets = [0, 256], sizes = [8, 128], strides = [1, 1]} : vector<8x384xf32> to vector<8x128xf32>
    %137 = arith.mulf %135, %136 : vector<8x128xf32>
    %138 = arith.addf %134, %137 : vector<8x128xf32>
    %139 = math.tanh %138 : vector<8x128xf32>
    %140 = vector.extract_strided_slice %133 {offsets = [0, 128], sizes = [8, 128], strides = [1, 1]} : vector<8x256xf32> to vector<8x128xf32>
    %141 = arith.andi %122, %6 : vector<8x128xi1>
    %cst_40 = arith.constant 1.000000e+00 : f32
    %142 = vector.broadcast %cst_40 : f32 to vector<8x128xf32>
    %143 = arith.subf %142, %140 : vector<8x128xf32>
    %144 = arith.mulf %143, %139 : vector<8x128xf32>
    %145 = arith.mulf %140, %120 : vector<8x128xf32>
    %146 = arith.addf %144, %145 : vector<8x128xf32>
    %147 = arith.select %141, %146, %120 : vector<8x128xi1>, vector<8x128xf32>
    %148 = arith.truncf %147 : vector<8x128xf32> to vector<8x128xbf16>
    %c0_41 = arith.constant 0 : index
    %c0_42 = arith.constant 0 : index
    %149 = vector.load %arg5[%c0_41, %c0_42] : memref<128x896xbf16, #tpu.memory_space<vmem>>, vector<128x896xbf16>
    %cst_43 = arith.constant dense<0.000000e+00> : vector<8x896xf32>
    %150 = tpu.matmul %148, %149, %cst_43 {dimension_numbers = #tpu.dot_dimension_numbers<[1], [0], [0], [1], [0, 0, 1, 1], [], []>} : vector<8x128xbf16>, vector<128x896xbf16>, vector<8x896xf32> -> vector<8x896xf32>
    %151 = vector.extract_strided_slice %150 {offsets = [0, 512], sizes = [8, 384], strides = [1, 1]} : vector<8x896xf32> to vector<8x384xf32>
    %152 = vector.extract_strided_slice %150 {offsets = [0, 0], sizes = [8, 256], strides = [1, 1]} : vector<8x896xf32> to vector<8x256xf32>
    %cst_44 = arith.constant 5.000000e-01 : f32
    %153 = vector.broadcast %cst_44 : f32 to vector<8x256xf32>
    %154 = arith.mulf %153, %152 : vector<8x256xf32>
    %155 = math.tanh %154 : vector<8x256xf32>
    %cst_45 = arith.constant 5.000000e-01 : f32
    %156 = vector.broadcast %cst_45 : f32 to vector<8x256xf32>
    %157 = arith.mulf %156, %155 : vector<8x256xf32>
    %cst_46 = arith.constant 5.000000e-01 : f32
    %158 = vector.broadcast %cst_46 : f32 to vector<8x256xf32>
    %159 = arith.addf %157, %158 : vector<8x256xf32>
    %160 = vector.extract_strided_slice %150 {offsets = [0, 256], sizes = [8, 128], strides = [1, 1]} : vector<8x896xf32> to vector<8x128xf32>
    %161 = vector.extract_strided_slice %159 {offsets = [0, 0], sizes = [8, 128], strides = [1, 1]} : vector<8x256xf32> to vector<8x128xf32>
    %162 = vector.extract_strided_slice %150 {offsets = [0, 384], sizes = [8, 128], strides = [1, 1]} : vector<8x896xf32> to vector<8x128xf32>
    %163 = arith.mulf %161, %162 : vector<8x128xf32>
    %164 = arith.addf %160, %163 : vector<8x128xf32>
    %165 = math.tanh %164 : vector<8x128xf32>
    %166 = vector.extract_strided_slice %159 {offsets = [0, 128], sizes = [8, 128], strides = [1, 1]} : vector<8x256xf32> to vector<8x128xf32>
    %167 = arith.andi %122, %11 : vector<8x128xi1>
    %cst_47 = arith.constant 1.000000e+00 : f32
    %168 = vector.broadcast %cst_47 : f32 to vector<8x128xf32>
    %169 = arith.subf %168, %166 : vector<8x128xf32>
    %170 = arith.mulf %169, %165 : vector<8x128xf32>
    %171 = arith.mulf %166, %147 : vector<8x128xf32>
    %172 = arith.addf %170, %171 : vector<8x128xf32>
    %173 = arith.select %167, %172, %147 : vector<8x128xi1>, vector<8x128xf32>
    %c3_i32 = arith.constant 3 : i32
    %174 = vector.broadcast %c3_i32 : i32 to vector<8x128xi32>
    %175 = arith.cmpi sgt, %12, %174 : vector<8x128xi32>
    %c24 = arith.constant 24 : index
    %c0_48 = arith.constant 0 : index
    %176 = vector.load %arg8[%c24, %c0_48] : memref<48x384xf32, #tpu.memory_space<vmem>>, vector<8x384xf32>
    %177 = vector.extract_strided_slice %176 {offsets = [0, 0], sizes = [8, 256], strides = [1, 1]} : vector<8x384xf32> to vector<8x256xf32>
    %178 = vector.extract_strided_slice %151 {offsets = [0, 0], sizes = [8, 256], strides = [1, 1]} : vector<8x384xf32> to vector<8x256xf32>
    %179 = arith.addf %177, %178 : vector<8x256xf32>
    %cst_49 = arith.constant 5.000000e-01 : f32
    %180 = vector.broadcast %cst_49 : f32 to vector<8x256xf32>
    %181 = arith.mulf %180, %179 : vector<8x256xf32>
    %182 = math.tanh %181 : vector<8x256xf32>
    %cst_50 = arith.constant 5.000000e-01 : f32
    %183 = vector.broadcast %cst_50 : f32 to vector<8x256xf32>
    %184 = arith.mulf %183, %182 : vector<8x256xf32>
    %cst_51 = arith.constant 5.000000e-01 : f32
    %185 = vector.broadcast %cst_51 : f32 to vector<8x256xf32>
    %186 = arith.addf %184, %185 : vector<8x256xf32>
    %187 = vector.extract_strided_slice %176 {offsets = [0, 256], sizes = [8, 128], strides = [1, 1]} : vector<8x384xf32> to vector<8x128xf32>
    %188 = vector.extract_strided_slice %186 {offsets = [0, 0], sizes = [8, 128], strides = [1, 1]} : vector<8x256xf32> to vector<8x128xf32>
    %189 = vector.extract_strided_slice %151 {offsets = [0, 256], sizes = [8, 128], strides = [1, 1]} : vector<8x384xf32> to vector<8x128xf32>
    %190 = arith.mulf %188, %189 : vector<8x128xf32>
    %191 = arith.addf %187, %190 : vector<8x128xf32>
    %192 = math.tanh %191 : vector<8x128xf32>
    %193 = vector.extract_strided_slice %186 {offsets = [0, 128], sizes = [8, 128], strides = [1, 1]} : vector<8x256xf32> to vector<8x128xf32>
    %194 = arith.andi %175, %6 : vector<8x128xi1>
    %cst_52 = arith.constant 1.000000e+00 : f32
    %195 = vector.broadcast %cst_52 : f32 to vector<8x128xf32>
    %196 = arith.subf %195, %193 : vector<8x128xf32>
    %197 = arith.mulf %196, %192 : vector<8x128xf32>
    %198 = arith.mulf %193, %173 : vector<8x128xf32>
    %199 = arith.addf %197, %198 : vector<8x128xf32>
    %200 = arith.select %194, %199, %173 : vector<8x128xi1>, vector<8x128xf32>
    %201 = arith.truncf %200 : vector<8x128xf32> to vector<8x128xbf16>
    %c0_53 = arith.constant 0 : index
    %c0_54 = arith.constant 0 : index
    %202 = vector.load %arg5[%c0_53, %c0_54] : memref<128x896xbf16, #tpu.memory_space<vmem>>, vector<128x896xbf16>
    %cst_55 = arith.constant dense<0.000000e+00> : vector<8x896xf32>
    %203 = tpu.matmul %201, %202, %cst_55 {dimension_numbers = #tpu.dot_dimension_numbers<[1], [0], [0], [1], [0, 0, 1, 1], [], []>} : vector<8x128xbf16>, vector<128x896xbf16>, vector<8x896xf32> -> vector<8x896xf32>
    %204 = vector.extract_strided_slice %203 {offsets = [0, 512], sizes = [8, 384], strides = [1, 1]} : vector<8x896xf32> to vector<8x384xf32>
    %205 = vector.extract_strided_slice %203 {offsets = [0, 0], sizes = [8, 256], strides = [1, 1]} : vector<8x896xf32> to vector<8x256xf32>
    %cst_56 = arith.constant 5.000000e-01 : f32
    %206 = vector.broadcast %cst_56 : f32 to vector<8x256xf32>
    %207 = arith.mulf %206, %205 : vector<8x256xf32>
    %208 = math.tanh %207 : vector<8x256xf32>
    %cst_57 = arith.constant 5.000000e-01 : f32
    %209 = vector.broadcast %cst_57 : f32 to vector<8x256xf32>
    %210 = arith.mulf %209, %208 : vector<8x256xf32>
    %cst_58 = arith.constant 5.000000e-01 : f32
    %211 = vector.broadcast %cst_58 : f32 to vector<8x256xf32>
    %212 = arith.addf %210, %211 : vector<8x256xf32>
    %213 = vector.extract_strided_slice %203 {offsets = [0, 256], sizes = [8, 128], strides = [1, 1]} : vector<8x896xf32> to vector<8x128xf32>
    %214 = vector.extract_strided_slice %212 {offsets = [0, 0], sizes = [8, 128], strides = [1, 1]} : vector<8x256xf32> to vector<8x128xf32>
    %215 = vector.extract_strided_slice %203 {offsets = [0, 384], sizes = [8, 128], strides = [1, 1]} : vector<8x896xf32> to vector<8x128xf32>
    %216 = arith.mulf %214, %215 : vector<8x128xf32>
    %217 = arith.addf %213, %216 : vector<8x128xf32>
    %218 = math.tanh %217 : vector<8x128xf32>
    %219 = vector.extract_strided_slice %212 {offsets = [0, 128], sizes = [8, 128], strides = [1, 1]} : vector<8x256xf32> to vector<8x128xf32>
    %220 = arith.andi %175, %11 : vector<8x128xi1>
    %cst_59 = arith.constant 1.000000e+00 : f32
    %221 = vector.broadcast %cst_59 : f32 to vector<8x128xf32>
    %222 = arith.subf %221, %219 : vector<8x128xf32>
    %223 = arith.mulf %222, %218 : vector<8x128xf32>
    %224 = arith.mulf %219, %200 : vector<8x128xf32>
    %225 = arith.addf %223, %224 : vector<8x128xf32>
    %226 = arith.select %220, %225, %200 : vector<8x128xi1>, vector<8x128xf32>
    %c4_i32 = arith.constant 4 : i32
    %227 = vector.broadcast %c4_i32 : i32 to vector<8x128xi32>
    %228 = arith.cmpi sgt, %12, %227 : vector<8x128xi32>
    %c32 = arith.constant 32 : index
    %c0_60 = arith.constant 0 : index
    %229 = vector.load %arg8[%c32, %c0_60] : memref<48x384xf32, #tpu.memory_space<vmem>>, vector<8x384xf32>
    %230 = vector.extract_strided_slice %229 {offsets = [0, 0], sizes = [8, 256], strides = [1, 1]} : vector<8x384xf32> to vector<8x256xf32>
    %231 = vector.extract_strided_slice %204 {offsets = [0, 0], sizes = [8, 256], strides = [1, 1]} : vector<8x384xf32> to vector<8x256xf32>
    %232 = arith.addf %230, %231 : vector<8x256xf32>
    %cst_61 = arith.constant 5.000000e-01 : f32
    %233 = vector.broadcast %cst_61 : f32 to vector<8x256xf32>
    %234 = arith.mulf %233, %232 : vector<8x256xf32>
    %235 = math.tanh %234 : vector<8x256xf32>
    %cst_62 = arith.constant 5.000000e-01 : f32
    %236 = vector.broadcast %cst_62 : f32 to vector<8x256xf32>
    %237 = arith.mulf %236, %235 : vector<8x256xf32>
    %cst_63 = arith.constant 5.000000e-01 : f32
    %238 = vector.broadcast %cst_63 : f32 to vector<8x256xf32>
    %239 = arith.addf %237, %238 : vector<8x256xf32>
    %240 = vector.extract_strided_slice %229 {offsets = [0, 256], sizes = [8, 128], strides = [1, 1]} : vector<8x384xf32> to vector<8x128xf32>
    %241 = vector.extract_strided_slice %239 {offsets = [0, 0], sizes = [8, 128], strides = [1, 1]} : vector<8x256xf32> to vector<8x128xf32>
    %242 = vector.extract_strided_slice %204 {offsets = [0, 256], sizes = [8, 128], strides = [1, 1]} : vector<8x384xf32> to vector<8x128xf32>
    %243 = arith.mulf %241, %242 : vector<8x128xf32>
    %244 = arith.addf %240, %243 : vector<8x128xf32>
    %245 = math.tanh %244 : vector<8x128xf32>
    %246 = vector.extract_strided_slice %239 {offsets = [0, 128], sizes = [8, 128], strides = [1, 1]} : vector<8x256xf32> to vector<8x128xf32>
    %247 = arith.andi %228, %6 : vector<8x128xi1>
    %cst_64 = arith.constant 1.000000e+00 : f32
    %248 = vector.broadcast %cst_64 : f32 to vector<8x128xf32>
    %249 = arith.subf %248, %246 : vector<8x128xf32>
    %250 = arith.mulf %249, %245 : vector<8x128xf32>
    %251 = arith.mulf %246, %226 : vector<8x128xf32>
    %252 = arith.addf %250, %251 : vector<8x128xf32>
    %253 = arith.select %247, %252, %226 : vector<8x128xi1>, vector<8x128xf32>
    %254 = arith.truncf %253 : vector<8x128xf32> to vector<8x128xbf16>
    %c0_65 = arith.constant 0 : index
    %c0_66 = arith.constant 0 : index
    %255 = vector.load %arg5[%c0_65, %c0_66] : memref<128x896xbf16, #tpu.memory_space<vmem>>, vector<128x896xbf16>
    %cst_67 = arith.constant dense<0.000000e+00> : vector<8x896xf32>
    %256 = tpu.matmul %254, %255, %cst_67 {dimension_numbers = #tpu.dot_dimension_numbers<[1], [0], [0], [1], [0, 0, 1, 1], [], []>} : vector<8x128xbf16>, vector<128x896xbf16>, vector<8x896xf32> -> vector<8x896xf32>
    %257 = vector.extract_strided_slice %256 {offsets = [0, 512], sizes = [8, 384], strides = [1, 1]} : vector<8x896xf32> to vector<8x384xf32>
    %258 = vector.extract_strided_slice %256 {offsets = [0, 0], sizes = [8, 256], strides = [1, 1]} : vector<8x896xf32> to vector<8x256xf32>
    %cst_68 = arith.constant 5.000000e-01 : f32
    %259 = vector.broadcast %cst_68 : f32 to vector<8x256xf32>
    %260 = arith.mulf %259, %258 : vector<8x256xf32>
    %261 = math.tanh %260 : vector<8x256xf32>
    %cst_69 = arith.constant 5.000000e-01 : f32
    %262 = vector.broadcast %cst_69 : f32 to vector<8x256xf32>
    %263 = arith.mulf %262, %261 : vector<8x256xf32>
    %cst_70 = arith.constant 5.000000e-01 : f32
    %264 = vector.broadcast %cst_70 : f32 to vector<8x256xf32>
    %265 = arith.addf %263, %264 : vector<8x256xf32>
    %266 = vector.extract_strided_slice %256 {offsets = [0, 256], sizes = [8, 128], strides = [1, 1]} : vector<8x896xf32> to vector<8x128xf32>
    %267 = vector.extract_strided_slice %265 {offsets = [0, 0], sizes = [8, 128], strides = [1, 1]} : vector<8x256xf32> to vector<8x128xf32>
    %268 = vector.extract_strided_slice %256 {offsets = [0, 384], sizes = [8, 128], strides = [1, 1]} : vector<8x896xf32> to vector<8x128xf32>
    %269 = arith.mulf %267, %268 : vector<8x128xf32>
    %270 = arith.addf %266, %269 : vector<8x128xf32>
    %271 = math.tanh %270 : vector<8x128xf32>
    %272 = vector.extract_strided_slice %265 {offsets = [0, 128], sizes = [8, 128], strides = [1, 1]} : vector<8x256xf32> to vector<8x128xf32>
    %273 = arith.andi %228, %11 : vector<8x128xi1>
    %cst_71 = arith.constant 1.000000e+00 : f32
    %274 = vector.broadcast %cst_71 : f32 to vector<8x128xf32>
    %275 = arith.subf %274, %272 : vector<8x128xf32>
    %276 = arith.mulf %275, %271 : vector<8x128xf32>
    %277 = arith.mulf %272, %253 : vector<8x128xf32>
    %278 = arith.addf %276, %277 : vector<8x128xf32>
    %279 = arith.select %273, %278, %253 : vector<8x128xi1>, vector<8x128xf32>
    %c5_i32 = arith.constant 5 : i32
    %280 = vector.broadcast %c5_i32 : i32 to vector<8x128xi32>
    %281 = arith.cmpi sgt, %12, %280 : vector<8x128xi32>
    %c40 = arith.constant 40 : index
    %c0_72 = arith.constant 0 : index
    %282 = vector.load %arg8[%c40, %c0_72] : memref<48x384xf32, #tpu.memory_space<vmem>>, vector<8x384xf32>
    %283 = vector.extract_strided_slice %282 {offsets = [0, 0], sizes = [8, 256], strides = [1, 1]} : vector<8x384xf32> to vector<8x256xf32>
    %284 = vector.extract_strided_slice %257 {offsets = [0, 0], sizes = [8, 256], strides = [1, 1]} : vector<8x384xf32> to vector<8x256xf32>
    %285 = arith.addf %283, %284 : vector<8x256xf32>
    %cst_73 = arith.constant 5.000000e-01 : f32
    %286 = vector.broadcast %cst_73 : f32 to vector<8x256xf32>
    %287 = arith.mulf %286, %285 : vector<8x256xf32>
    %288 = math.tanh %287 : vector<8x256xf32>
    %cst_74 = arith.constant 5.000000e-01 : f32
    %289 = vector.broadcast %cst_74 : f32 to vector<8x256xf32>
    %290 = arith.mulf %289, %288 : vector<8x256xf32>
    %cst_75 = arith.constant 5.000000e-01 : f32
    %291 = vector.broadcast %cst_75 : f32 to vector<8x256xf32>
    %292 = arith.addf %290, %291 : vector<8x256xf32>
    %293 = vector.extract_strided_slice %282 {offsets = [0, 256], sizes = [8, 128], strides = [1, 1]} : vector<8x384xf32> to vector<8x128xf32>
    %294 = vector.extract_strided_slice %292 {offsets = [0, 0], sizes = [8, 128], strides = [1, 1]} : vector<8x256xf32> to vector<8x128xf32>
    %295 = vector.extract_strided_slice %257 {offsets = [0, 256], sizes = [8, 128], strides = [1, 1]} : vector<8x384xf32> to vector<8x128xf32>
    %296 = arith.mulf %294, %295 : vector<8x128xf32>
    %297 = arith.addf %293, %296 : vector<8x128xf32>
    %298 = math.tanh %297 : vector<8x128xf32>
    %299 = vector.extract_strided_slice %292 {offsets = [0, 128], sizes = [8, 128], strides = [1, 1]} : vector<8x256xf32> to vector<8x128xf32>
    %300 = arith.andi %281, %6 : vector<8x128xi1>
    %cst_76 = arith.constant 1.000000e+00 : f32
    %301 = vector.broadcast %cst_76 : f32 to vector<8x128xf32>
    %302 = arith.subf %301, %299 : vector<8x128xf32>
    %303 = arith.mulf %302, %298 : vector<8x128xf32>
    %304 = arith.mulf %299, %279 : vector<8x128xf32>
    %305 = arith.addf %303, %304 : vector<8x128xf32>
    %306 = arith.select %300, %305, %279 : vector<8x128xi1>, vector<8x128xf32>
    %307 = arith.truncf %306 : vector<8x128xf32> to vector<8x128xbf16>
    %c0_77 = arith.constant 0 : index
    %c0_78 = arith.constant 0 : index
    %308 = vector.load %arg5[%c0_77, %c0_78] : memref<128x896xbf16, #tpu.memory_space<vmem>>, vector<128x896xbf16>
    %cst_79 = arith.constant dense<0.000000e+00> : vector<8x896xf32>
    %309 = tpu.matmul %307, %308, %cst_79 {dimension_numbers = #tpu.dot_dimension_numbers<[1], [0], [0], [1], [0, 0, 1, 1], [], []>} : vector<8x128xbf16>, vector<128x896xbf16>, vector<8x896xf32> -> vector<8x896xf32>
    %310 = vector.extract_strided_slice %309 {offsets = [0, 0], sizes = [8, 256], strides = [1, 1]} : vector<8x896xf32> to vector<8x256xf32>
    %cst_80 = arith.constant 5.000000e-01 : f32
    %311 = vector.broadcast %cst_80 : f32 to vector<8x256xf32>
    %312 = arith.mulf %311, %310 : vector<8x256xf32>
    %313 = math.tanh %312 : vector<8x256xf32>
    %cst_81 = arith.constant 5.000000e-01 : f32
    %314 = vector.broadcast %cst_81 : f32 to vector<8x256xf32>
    %315 = arith.mulf %314, %313 : vector<8x256xf32>
    %cst_82 = arith.constant 5.000000e-01 : f32
    %316 = vector.broadcast %cst_82 : f32 to vector<8x256xf32>
    %317 = arith.addf %315, %316 : vector<8x256xf32>
    %318 = vector.extract_strided_slice %309 {offsets = [0, 256], sizes = [8, 128], strides = [1, 1]} : vector<8x896xf32> to vector<8x128xf32>
    %319 = vector.extract_strided_slice %317 {offsets = [0, 0], sizes = [8, 128], strides = [1, 1]} : vector<8x256xf32> to vector<8x128xf32>
    %320 = vector.extract_strided_slice %309 {offsets = [0, 384], sizes = [8, 128], strides = [1, 1]} : vector<8x896xf32> to vector<8x128xf32>
    %321 = arith.mulf %319, %320 : vector<8x128xf32>
    %322 = arith.addf %318, %321 : vector<8x128xf32>
    %323 = math.tanh %322 : vector<8x128xf32>
    %324 = vector.extract_strided_slice %317 {offsets = [0, 128], sizes = [8, 128], strides = [1, 1]} : vector<8x256xf32> to vector<8x128xf32>
    %325 = arith.andi %281, %11 : vector<8x128xi1>
    %cst_83 = arith.constant 1.000000e+00 : f32
    %326 = vector.broadcast %cst_83 : f32 to vector<8x128xf32>
    %327 = arith.subf %326, %324 : vector<8x128xf32>
    %328 = arith.mulf %327, %323 : vector<8x128xf32>
    %329 = arith.mulf %324, %306 : vector<8x128xf32>
    %330 = arith.addf %328, %329 : vector<8x128xf32>
    %331 = arith.select %325, %330, %306 : vector<8x128xi1>, vector<8x128xf32>
    %332 = arith.truncf %331 : vector<8x128xf32> to vector<8x128xbf16>
    %c0_84 = arith.constant 0 : index
    %c0_85 = arith.constant 0 : index
    %333 = vector.load %arg6[%c0_84, %c0_85] : memref<128x256xbf16, #tpu.memory_space<vmem>>, vector<128x256xbf16>
    %cst_86 = arith.constant dense<0.000000e+00> : vector<8x256xf32>
    %334 = tpu.matmul %332, %333, %cst_86 {dimension_numbers = #tpu.dot_dimension_numbers<[1], [0], [0], [1], [0, 0, 1, 1], [], []>} : vector<8x128xbf16>, vector<128x256xbf16>, vector<8x256xf32> -> vector<8x256xf32>
    %c0_87 = arith.constant 0 : index
    %c0_88 = arith.constant 0 : index
    %335 = vector.load %arg7[%c0_87, %c0_88] : memref<8x256xf32, #tpu.memory_space<vmem>>, vector<8x256xf32>
    tpu.vector_store %arg7[%c0_87, %c0_88], %334 {strides = array<i32>} : memref<8x256xf32, #tpu.memory_space<vmem>>, vector<8x256xf32>,
    return
  }
}

</mosaic_0001>

<bundles_post_ra>
// kernel: tpu_custom_call.1
= control target key start
LH: loop header
LB: loop body
LE: loop exit
PB: predicated region body
PF: predicated region fallthrough
CT: control target
= control target key end

     0   :  { %12 = vsyncpa [#allocation4], 0  ;;  %s3364_s0 = inlined_call_operand.vmem [shape: f32[48,5], index: 0, kind: input, shape index: {}]   ;;  %s3365_s1 = inlined_call_operand.vmem [shape: s32[8,128], index: 1, kind: input, shape index: {}]   ;;  %s3366_s2 = inlined_call_operand.hbm [shape: f32[8,128], index: 2, kind: input, shape index: {}]   ;;  %s3367_s3 = inlined_call_operand.vmem [shape: f32[8,384], index: 3, kind: input, shape index: {}]   ;;  %s3368_s4 = inlined_call_operand.vmem [shape: f32[5,384], index: 4, kind: input, shape index: {}]   ;;  %s3369_s5 = inlined_call_operand.hbm [shape: bf16[128,896], index: 5, kind: input, shape index: {}]   ;;  %s3370_s6 = inlined_call_operand.hbm [shape: bf16[128,256], index: 6, kind: input, shape index: {}]   ;;  %s3371_s7 = inlined_call_operand.hbm [shape: f32[8,256], index: 7, kind: output, shape index: {}]  }
   0x1   :  { %13 = vsyncpa [#allocation7], 0 }
   0x2   :  { %14 = vsyncpa [#allocation5], 0  ;;  %s2561_s24 = smov [#allocation6]  }
   0x3   :  { %s38_s25 = sshll.u32 %s2561_s24, 4  ;;  %s39_s25 = int_to_ptr.vmem [resolvable:$true] %s38_s25 }
   0x4   :  { %s2483_s26 = scalar_lea.vmem %s39_s25, 7168  ;;  %p2488_p1 = scmp.lt.s32.totalorder %s39_s25, %s39_s25 }
   0x5   :  { %p2484_p0 = scmp.ne.s32.totalorder %s39_s25, %s2483_s26  ;;  %p2489_p2 = scmp.lt.s32.totalorder %s2483_s26, %s2483_s26 }
   0x7   :  { %p2490_p3 = por %p2489_p2, %p2488_p1 }
   0x9   :  { %p2491_p4 = pnand %p2490_p3, %p2484_p0 }
   0xb   :  { %2494 = shalt.err (!%p2491_p4)
}
   0xc   :  { %s2562_s27 = smov 448   ;;  %s2563_s28 = smov 28  }
   0xd   :  { %44 = dma.hbm_to_vmem [thread:$0]  %s3369_s5, 7168, %s39_s25, [#allocation7], %s2562_s27, %s2562_s27, %s2563_s28  }
   0xe   :  { %s2564_s8 = smov [#allocation3]   ;;  %s2565_s10 = smov [#allocation8]  }
   0xf   :  { %s25_s9 = sshll.u32 %s2564_s8, 4  ;;  %s50_s11 = sshll.u32 %s2565_s10, 4  ;;  %s26_s9 = int_to_ptr.vmem [resolvable:$true] %s25_s9  ;;  %s51_s11 = int_to_ptr.vmem [resolvable:$true] %s50_s11 }
  0x10   :  { %s2503_s12 = scalar_lea.vmem %s26_s9, 128  ;;  %p2508_p6 = scmp.lt.s32.totalorder %s26_s9, %s26_s9 }
  0x11   :  { %p2504_p5 = scmp.ne.s32.totalorder %s26_s9, %s2503_s12  ;;  %p2509_p7 = scmp.lt.s32.totalorder %s2503_s12, %s2503_s12 }
  0x13   :  { %p2510_p8 = por %p2509_p7, %p2508_p6 }
  0x15   :  { %p2511_p9 = pnand %p2510_p8, %p2504_p5 }
  0x17   :  { %2514 = shalt.err (!%p2511_p9)
}
  0x18   :  { %28 = dma.hbm_to_vmem [thread:$0]  %s3366_s2, 128, %s26_s9, [#allocation4]  }
  0x19   :  { %s2523_s15 = scalar_lea.vmem %s51_s11, 2048  ;;  %p2528_p11 = scmp.lt.s32.totalorder %s51_s11, %s51_s11 }
  0x1a   :  { %p2524_p10 = scmp.ne.s32.totalorder %s51_s11, %s2523_s15  ;;  %p2529_p12 = scmp.lt.s32.totalorder %s2523_s15, %s2523_s15 }
  0x1c   :  { %p2530_p13 = por %p2529_p12, %p2528_p11 }
  0x1e   :  { %p2531_p0 = pnand %p2530_p13, %p2524_p10 }
  0x20   :  { %2534 = shalt.err (!%p2531_p0)
}
  0x21   :  { %s2566_s5 = smov 128   ;;  %s2567_s16 = smov 8  }
  0x22   :  { %56 = dma.hbm_to_vmem [thread:$0]  %s3370_s6, 2048, %s51_s11, [#allocation7], %s2566_s5, %s2566_s5, %s2567_s16  }
  0x23   :  { %2555 = dma.done.wait [#allocation4], 128  }
  0x24   :  { %2556 = vsyncadd [#allocation4], 4294967168 }
  0x25   :  { %2557 = dma.done.wait [#allocation7], 9216  }
  0x26   :  { %2558 = vsyncadd [#allocation7], 4294958080  ;;  %v3402_v0 = vmov 0.0   ;;  %vm95_vm0 = vcmask 1044480   ;;  %v74_v1 = vld [vmem:[%s3368_s4 + $0x8] sm:$0x1f] }
  0x27   :  { %169 = vmatprep.mubr.f32.mxu1 %v3402_v0  ;;  %v73_v2 = vld [vmem:[%s3368_s4] sm:$0x1f]  ;;  %vm76_vm1 = vcmask 39936   ;;  %1981 = vmatprep.subr.msk.mxu1 %vm95_vm0, %v74_v1  ;;  %v75_v4 = vld [vmem:[%s3368_s4 + $0x10] sm:$0x1f]  ;;  %v68_v5 = vld [vmem:[%s3364_s0 + $0x8] sm:$0xff] }
  0x28   :  { %v67_v3 = vld [vmem:[%s3364_s0] sm:$0xff]  ;;  %1982 = vmatpush1.msk.msra.mxu1 %vm95_vm0, %v73_v2  ;;  %v69_v6 = vld [vmem:[%s3364_s0 + $0x10] sm:$0xff]  ;;  %v70_v7 = vld [vmem:[%s3364_s0 + $0x18] sm:$0xff]  ;;  %v3372_v43 = vmov 0   ;;  %vm2570_vm5 = vmmov 0  }
  0x29   :  { %1983 = vmatmul.mubr.msk.f32.vlgmr.msra.gmra.mxu1 %vm76_vm1, %v67_v3  ;;  %2120 = vmatprep.subr.msk.mxu1 %vm95_vm0, %v75_v4  ;;  %v71_v8 = vld [vmem:[%s3364_s0 + $0x20] sm:$0xff]  ;;  %v72_v9 = vld [vmem:[%s3364_s0 + $0x28] sm:$0xff]  ;;  %v2666_v10 = vld [vmem:[#allocation6 + $0x18c] ss:$28 sps:$4 sm:$0xff]  }
  0x2a   :  { %2121 = vmatpush3.msk.msra.mxu1 %vm95_vm0, %v75_v4  ;;  %175 = vmatprep.mubr.f32.mxu1 %v3402_v0  ;;  %v2668_v11 = vld [vmem:[#allocation6 + $0x194] ss:$28 sps:$4 sm:$0xff]   ;;  %v2670_v12 = vld [vmem:[#allocation6 + $0x188] ss:$28 sps:$4 sm:$0xff]   ;;  %v2680_v15 = vld [vmem:[#allocation6 + $0x15c] ss:$28 sps:$4 sm:$0xff]  }
  0x2b   :  { %v2672_v13 = vld [vmem:[#allocation6 + $0x190] ss:$28 sps:$4 sm:$0xff]   ;;  %706 = vmatprep.subr.bf16.mxu0 %v2666_v10  ;;  %747 = vmatprep.subr.bf16.mxu1 %v2668_v11  ;;  %v2684_v17 = vld [vmem:[#allocation6 + $0x158] ss:$28 sps:$4 sm:$0xff]   ;;  %v2692_v19 = vld [vmem:[#allocation6 + $0x124] ss:$28 sps:$4 sm:$0xff]  }
  0x2c   :  { %707 = vmatpush1.bf16.msra.mxu0 %v2670_v12  ;;  %v2678_v14 = vld [vmem:[#allocation6 + $0x154] ss:$28 sps:$4 sm:$0xff]   ;;  %v2690_v18 = vld [vmem:[#allocation6 + $0x11c] ss:$28 sps:$4 sm:$0xff]   ;;  %v2702_v22 = vld [vmem:[#allocation6 + $0xe4] ss:$28 sps:$4 sm:$0xff]   ;;  %738 = vmatprep.mubr.bf16.mxu0 %v3372_v43 }
  0x2d   :  { %1984 = vmatmul.mubr.msk.f32.gmra.mxu1 %vm76_vm1, %v68_v5  ;;  %v2682_v16 = vld [vmem:[#allocation6 + $0x150] ss:$28 sps:$4 sm:$0xff]   ;;  %708 = vmatprep.subr.bf16.mxu0 %v2678_v14  ;;  %v2694_v20 = vld [vmem:[#allocation6 + $0x118] ss:$28 sps:$4 sm:$0xff]   ;;  %v2696_v21 = vld [vmem:[#allocation6 + $0x120] ss:$28 sps:$4 sm:$0xff]  }
  0x2e   :  { %181 = vmatprep.mubr.f32.mxu1 %v3402_v0  ;;  %3418 = vst [vmem:[#allocation13_spill] sm:$0xff] %v2702_v22  ;;  %v2704_v23 = vld [vmem:[#allocation6 + $0xec] ss:$28 sps:$4 sm:$0xff]   ;;  %v2706_v24 = vld [vmem:[#allocation6 + $0xe0] ss:$28 sps:$4 sm:$0xff]  }
  0x2f   :  { %3419 = vst [vmem:[#allocation14_spill] sm:$0xff] %v2704_v23  ;;  %3420 = vst [vmem:[#allocation15_spill] sm:$0xff] %v2706_v24  ;;  %v2708_v25 = vld [vmem:[#allocation6 + $0xe8] ss:$28 sps:$4 sm:$0xff]   ;;  %v2716_v27 = vld [vmem:[#allocation6 + $0xb4] ss:$28 sps:$4 sm:$0xff]  }
  0x30   :  { %709 = vmatpush1.bf16.msra.mxu0 %v2682_v16  ;;  %3421 = vst [vmem:[#allocation16_spill] sm:$0xff] %v2708_v25  ;;  %v2714_v26 = vld [vmem:[#allocation6 + $0xac] ss:$28 sps:$4 sm:$0xff]   ;;  %3423 = vst [vmem:[#allocation18_spill] sm:$0xff] %v2716_v27  ;;  %v2726_v30 = vld [vmem:[#allocation6 + $0x74] ss:$28 sps:$4 sm:$0xff]  }
  0x31   :  { %1985 = vmatmul.mubr.msk.f32.gmra.mxu1 %vm76_vm1, %v69_v6  ;;  %710 = vmatprep.subr.bf16.mxu0 %v2690_v18  ;;  %3422 = vst [vmem:[#allocation17_spill] sm:$0xff] %v2714_v26  ;;  %v2718_v28 = vld [vmem:[#allocation6 + $0xa8] ss:$28 sps:$4 sm:$0xff]   ;;  %v2720_v29 = vld [vmem:[#allocation6 + $0xb0] ss:$28 sps:$4 sm:$0xff]   ;;  %3426 = vst [vmem:[#allocation21_spill] sm:$0xff] %v2726_v30 }
  0x32   :  { %187 = vmatprep.mubr.f32.mxu1 %v3402_v0  ;;  %3424 = vst [vmem:[#allocation19_spill] sm:$0xff] %v2718_v28  ;;  %3425 = vst [vmem:[#allocation20_spill] sm:$0xff] %v2720_v29  ;;  %v2728_v31 = vld [vmem:[#allocation6 + $0x7c] ss:$28 sps:$4 sm:$0xff]   ;;  %v2730_v32 = vld [vmem:[#allocation6 + $0x70] ss:$28 sps:$4 sm:$0xff]  }
  0x33   :  { %3427 = vst [vmem:[#allocation22_spill] sm:$0xff] %v2728_v31  ;;  %3428 = vst [vmem:[#allocation23_spill] sm:$0xff] %v2730_v32  ;;  %v2732_v33 = vld [vmem:[#allocation6 + $0x78] ss:$28 sps:$4 sm:$0xff]   ;;  %v2740_v35 = vld [vmem:[#allocation6 + $0x44] ss:$28 sps:$4 sm:$0xff]  }
  0x34   :  { %711 = vmatpush1.bf16.msra.mxu0 %v2694_v20  ;;  %3429 = vst [vmem:[#allocation24_spill] sm:$0xff] %v2732_v33  ;;  %v2738_v34 = vld [vmem:[#allocation6 + $0x3c] ss:$28 sps:$4 sm:$0xff]   ;;  %3431 = vst [vmem:[#allocation26_spill] sm:$0xff] %v2740_v35  ;;  %v2750_v38 = vld [vmem:[#allocation6 + $0x4] ss:$28 sps:$4 sm:$0xff]  }
  0x35   :  { %1986 = vmatmul.mubr.msk.f32.gmra.mxu1 %vm76_vm1, %v70_v7  ;;  %712 = vmatprep.subr.bf16.mxu0 %v2702_v22  ;;  %3430 = vst [vmem:[#allocation25_spill] sm:$0xff] %v2738_v34  ;;  %v2742_v36 = vld [vmem:[#allocation6 + $0x38] ss:$28 sps:$4 sm:$0xff]   ;;  %v2744_v37 = vld [vmem:[#allocation6 + $0x40] ss:$28 sps:$4 sm:$0xff]   ;;  %3434 = vst [vmem:[#allocation29_spill] sm:$0xff] %v2750_v38 }
  0x36   :  { %193 = vmatprep.mubr.f32.mxu1 %v3402_v0  ;;  %3432 = vst [vmem:[#allocation27_spill] sm:$0xff] %v2742_v36  ;;  %3433 = vst [vmem:[#allocation28_spill] sm:$0xff] %v2744_v37  ;;  %v2752_v39 = vld [vmem:[#allocation6 + $0xc] ss:$28 sps:$4 sm:$0xff]   ;;  %v2754_v40 = vld [vmem:[#allocation6] ss:$28 sps:$4 sm:$0xff]  }
  0x37   :  { %3435 = vst [vmem:[#allocation30_spill] sm:$0xff] %v2752_v39  ;;  %3436 = vst [vmem:[#allocation31_spill] sm:$0xff] %v2754_v40  ;;  %v2756_v41 = vld [vmem:[#allocation6 + $0x8] ss:$28 sps:$4 sm:$0xff]   ;;  %v2758_v42 = vld [vmem:[#allocation6 + $0x19c] ss:$28 sps:$4 sm:$0xff]  }
  0x38   :  { %713 = vmatpush1.bf16.msra.mxu0 %v2706_v24  ;;  %3437 = vst [vmem:[#allocation32_spill] sm:$0xff] %v2756_v41  ;;  %3438 = vst [vmem:[#allocation33_spill] sm:$0xff] %v2758_v42  ;;  %v327_v44 = vld [vmem:[%s3367_s3] sm:$0xff]  ;;  %v328_v50 = vld [vmem:[%s3367_s3 + $0x8] sm:$0xff] }
  0x39   :  { %1987 = vmatmul.mubr.msk.f32.gmra.mxu1 %vm76_vm1, %v71_v8  ;;  %714 = vmatprep.subr.bf16.mxu0 %v2714_v26  ;;  %v329_v2 = vld [vmem:[%s3367_s3 + $0x10] sm:$0xff] }
  0x3a   :  { %199 = vmatprep.mubr.f32.mxu1 %v3402_v0 }
  0x3c   :  { %715 = vmatpush1.bf16.msra.mxu0 %v2718_v28 }
  0x3d   :  { %1988 = vmatmul.mubr.msk.f32.gmra.mxu1 %vm76_vm1, %v72_v9  ;;  %716 = vmatprep.subr.bf16.mxu0 %v2726_v30 }
  0x3e   :  { %2122 = vmatprep.mubr.msk.f32.mxu1 %vm76_vm1, %v67_v3 }
  0x40   :  { %717 = vmatpush1.bf16.msra.mxu0 %v2730_v32 }
  0x41   :  { %2123 = vmatmul.mubr.msk.f32.vlgmr.msra.gmra.mxu1 %vm76_vm1, %v68_v5  ;;  %718 = vmatprep.subr.bf16.mxu0 %v2738_v34 }
  0x42   :  { %2125 = vmatprep.mubr.msk.f32.mxu1 %vm76_vm1, %v69_v6  ;;  %748 = vmatpush1.bf16.msra.mxu1 %v2672_v13 }
  0x43   :  { %749 = vmatprep.subr.bf16.mxu1 %v2680_v15 }
  0x44   :  { %719 = vmatpush1.bf16.msra.mxu0 %v2742_v36 }
  0x45   :  { %2126 = vmatmul.mubr.msk.f32.gmra.mxu1 %vm76_vm1, %v70_v7  ;;  %720 = vmatprep.subr.bf16.mxu0 %v2750_v38 }
  0x46   :  { %2128 = vmatprep.mubr.msk.f32.mxu1 %vm76_vm1, %v71_v8  ;;  %750 = vmatpush1.bf16.msra.mxu1 %v2684_v17 }
  0x47   :  { %751 = vmatprep.subr.bf16.mxu1 %v2692_v19 }
  0x48   :  { %721 = vmatpush1.bf16.msra.mxu0 %v2754_v40 }
  0x49   :  { %2129 = vmatmul.mubr.msk.f32.gmra.mxu1 %vm76_vm1, %v72_v9  ;;  %788 = vmatprep.subr.bf16.mxu0 %v2758_v42  ;;  %v319_v9 = vlaneseq }
  0x4a   :  { %752 = vmatpush1.bf16.msra.mxu1 %v2696_v21  ;;  %779 = vmatprep.mubr.bf16.mxu1 %v3372_v43 }
  0x4b   :  { %753 = vmatprep.subr.bf16.mxu1 %v2704_v23 }
  0x4e   :  { %754 = vmatpush1.bf16.msra.mxu1 %v2708_v25 }
  0x4f   :  { %755 = vmatprep.subr.bf16.mxu1 %v2716_v27 }
  0x52   :  { %756 = vmatpush1.bf16.msra.mxu1 %v2720_v29 }
  0x53   :  { %757 = vmatprep.subr.bf16.mxu1 %v2728_v31 }
  0x56   :  { %758 = vmatpush1.bf16.msra.mxu1 %v2732_v33 }
  0x57   :  { %759 = vmatprep.subr.bf16.mxu1 %v2740_v35 }
  0x5a   :  { %760 = vmatpush1.bf16.msra.mxu1 %v2744_v37 }
  0x5b   :  { %761 = vmatprep.subr.bf16.mxu1 %v2752_v39 }
  0x5e   :  { %762 = vmatpush1.bf16.msra.mxu1 %v2756_v41 }
  0x5f   :  { %2131 = vmatprep.subr.bf16.mxu1 %v3402_v0 }
  0xe9   :  { %v171_v45 = vpop.f32.mrf.mxu1 }
  0xea   :  { %v334_v46 = vadd.f32 %v327_v44, %v171_v45  ;;  %v2799_v45 = vand.u32 127, %v319_v9  ;;  %v2837_v9 = vld [vmem:[#allocation6 + $0x128] ss:$28 sps:$4 sm:$0xff]  }
  0xeb   :  { %v173_v47 = vpop.f32.mrf.mxu1 }
  0xec   :  { %v336_v48 = vmul.f32 0.5, %v334_v46  ;;  %v335_v53 = vadd.f32 %v328_v50, %v173_v47  ;;  %v2804_v46 = vld [vmem:[%s3365_s1] sm:$0xff]  ;;  %vm321_vm2 = vcmp.lt.s32.totalorder %v2799_v45, 8  ;;  %vm322_vm6 = vcmp.ge.s32.totalorder %v2799_v45, 16 }
  0xed   :  { %v2771_v49 = vpop.f32.mrf.mxu1  ;;  %v326_v47 = vld [vmem:[#allocation3] sm:$0xff]  ;;  %vm330_vm3 = vcmp.gt.s32.totalorder %v2804_v46, 0  ;;  %vm323_vm7 = vcmp.lt.s32.totalorder %v2799_v45, 24  ;;  %vm886_vm10 = vcmp.gt.s32.totalorder %v2804_v46, 1  ;;  %vm1090_vm13 = vcmp.gt.s32.totalorder %v2804_v46, 2 }
  0xee   :  { %2346 = vtanh.f32 %v336_v48  ;;  %v337_v56 = vmul.f32 0.5, %v335_v53  ;;  %vm347_vm4 = vmand %vm330_vm3, %vm321_vm2  ;;  %vm1294_vm0 = vcmp.gt.s32.totalorder %v2804_v46, 3  ;;  %v2330_v45 = vld [vmem:[#allocation8 + $0x54] ss:$8 sps:$4 sm:$0xff]  }
  0xef   :  { %v2776_v51 = vpop.f32.mrf.mxu1  ;;  %vm2945_vm8 = vmand %vm322_vm6, %vm323_vm7 }
  0xf0   :  { %2348 = vtanh.f32 %v337_v56  ;;  %vm880_vm9 = vmand %vm330_vm3, %vm2945_vm8 }
  0xf1   :  { %v2778_v52 = vpop.f32.mrf.mxu1  ;;  %vm903_vm11 = vmand %vm886_vm10, %vm321_vm2 }
  0xf2   :  { %3439 = vst [vmem:[#allocation34_spill] sm:$0xff] %v2778_v52  ;;  %v2889_v52 = vld [vmem:[#allocation6 + $0x18] ss:$28 sps:$4 sm:$0xff]   ;;  %vm1084_vm12 = vmand %vm886_vm10, %vm2945_vm8 }
  0xf3   :  { %v2780_v54 = vpop.f32.mrf.mxu1  ;;  %vm1107_vm14 = vmand %vm1090_vm13, %vm321_vm2 }
  0xf4   :  { %3440 = vst [vmem:[#allocation35_spill] sm:$0xff] %v2780_v54  ;;  %v2887_v54 = vld [vmem:[#allocation6 + $0x10] ss:$28 sps:$4 sm:$0xff]   ;;  %vm1288_vm15 = vmand %vm1090_vm13, %vm2945_vm8 }
  0xf5   :  { %v2782_v55 = vpop.f32.mrf.mxu1  ;;  %vm1311_vm1 = vmand %vm1294_vm0, %vm321_vm2 }
  0xf6   :  { %3441 = vst [vmem:[#allocation36_spill] sm:$0xff] %v2782_v55  ;;  %v2883_v55 = vld [vmem:[#allocation6 + $0x14] ss:$28 sps:$4 sm:$0xff]   ;;  %vm1492_vm3 = vmand %vm1294_vm0, %vm2945_vm8 }
  0xf7   :  { %v2784_v57 = vpop.f32.mrf.mxu1  ;;  %3447 = vst [vmem:[#allocation42_spill] sm:$0xff] %v2883_v55 }
  0xf8   :  { %3442 = vst [vmem:[#allocation37_spill] sm:$0xff] %v2784_v57  ;;  %v2879_v57 = vld [vmem:[#allocation6 + $0x50] ss:$28 sps:$4 sm:$0xff]  }
  0xf9   :  { %v2786_v58 = vpop.f32.mrf.mxu1 }
  0xfa   :  { %3443 = vst [vmem:[#allocation38_spill] sm:$0xff] %v2786_v58  ;;  %v2877_v58 = vld [vmem:[#allocation6 + $0x48] ss:$28 sps:$4 sm:$0xff]  }
  0xfb   :  { %v2347_v59 = vpop.eup %2346  ;;  %v2788_v60 = vpop.f32.mrf.mxu1 }
  0xfc   :  { %3444 = vst [vmem:[#allocation39_spill] sm:$0xff] %v2788_v60  ;;  %v340_v61 = vmul.f32 0.5, %v2347_v59  ;;  %v2873_v60 = vld [vmem:[#allocation6 + $0x4c] ss:$28 sps:$4 sm:$0xff]  }
  0xfd   :  { %v2790_v62 = vpop.f32.mrf.mxu1  ;;  %v2349_v7 = vpop.eup %2348 }
  0xfe   :  { %3445 = vst [vmem:[#allocation40_spill] sm:$0xff] %v2790_v62  ;;  %v342_v63 = vadd.f32 0.5, %v340_v61  ;;  %v341_v8 = vmul.f32 0.5, %v2349_v7  ;;  %v2826_v7 = vld [vmem:[#allocation6 + $0x168] ss:$28 sps:$4 sm:$0xff]  }
  0xff   :  { %v2792_v1 = vpop.f32.mrf.mxu1  ;;  %v2869_v62 = vld [vmem:[#allocation6 + $0x88] ss:$28 sps:$4 sm:$0xff]  }
 0x100   :  { %3446 = vst [vmem:[#allocation41_spill] sm:$0xff] %v2792_v1  ;;  %v344_v4 = vmul.f32 %v342_v63, %v329_v2  ;;  %v343_v44 = vadd.f32 0.5, %v341_v8  ;;  %v2814_v63 = vld [vmem:[#allocation6 + $0x198] ss:$28 sps:$4 sm:$0xff]   ;;  %v2816_v2 = vld [vmem:[#allocation6 + $0x1a0] ss:$28 sps:$4 sm:$0xff]  }
 0x101   :  { %v2797_v3 = vpop.f32.mrf.mxu1  ;;  %v2830_v8 = vld [vmem:[#allocation6 + $0x12c] ss:$28 sps:$4 sm:$0xff]   ;;  %v2867_v1 = vld [vmem:[#allocation6 + $0x80] ss:$28 sps:$4 sm:$0xff]  }
 0x102   :  { %v348_v48 = vsub.f32 1.0, %v343_v44  ;;  %v350_v53 = vmul.f32 %v343_v44, %v326_v47  ;;  %v2839_v44 = vld [vmem:[#allocation6 + $0x130] ss:$28 sps:$4 sm:$0xff]  }
 0x103   :  { %v272_v5 = vpop.f32.mrf.mxu1 }
 0x104   :  { %v345_v6 = vadd.f32 %v344_v4, %v272_v5  ;;  %v2820_v5 = vld [vmem:[#allocation6 + $0x164] ss:$28 sps:$4 sm:$0xff]  }
 0x106   :  { %2350 = vtanh.f32 %v345_v6  ;;  %v2824_v6 = vld [vmem:[#allocation6 + $0x160] ss:$28 sps:$4 sm:$0xff]  }
 0x113   :  { %v2351_v50 = vpop.eup %2350 }
 0x114   :  { %v349_v56 = vmul.f32 %v2351_v50, %v348_v48  ;;  %v2847_v48 = vld [vmem:[#allocation6 + $0xf0] ss:$28 sps:$4 sm:$0xff]   ;;  %v2849_v50 = vld [vmem:[#allocation6 + $0xf8] ss:$28 sps:$4 sm:$0xff]  }
 0x116   :  { %v351_v59 = vadd.f32 %v350_v53, %v349_v56  ;;  %v2853_v53 = vld [vmem:[#allocation6 + $0xbc] ss:$28 sps:$4 sm:$0xff]  }
 0x117   :  { %v2857_v56 = vld [vmem:[#allocation6 + $0xb8] ss:$28 sps:$4 sm:$0xff]  }
 0x118   :  { %v2812_v61 = vsel %vm347_vm4, %v351_v59, %v326_v47  ;;  %v2843_v47 = vld [vmem:[#allocation6 + $0xf4] ss:$28 sps:$4 sm:$0xff]   ;;  %v2859_v59 = vld [vmem:[#allocation6 + $0xc0] ss:$28 sps:$4 sm:$0xff]  }
 0x119   :  { %v353_v4 = vpack.c.bf16 %v2812_v61, %v2812_v61 }
 0x11b   :  { %739 = vmatmul.mubr.bf16.vlgmr.msra.gmra.mxu0 %v353_v4  ;;  %780 = vmatmul.mubr.bf16.vlgmr.msra.gmra.mxu1 %v353_v4 }
 0x11c   :  { %789 = vmatpush1.bf16.msra.mxu0 %v2814_v63  ;;  %2132 = vmatpush3.bf16.msra.mxu1 %v2816_v2 }
 0x11d   :  { %790 = vmatprep.subr.bf16.mxu0 %v2820_v5  ;;  %2133 = vmatprep.subr.bf16.mxu1 %v3402_v0 }
 0x11e   :  { %820 = vmatprep.mubr.bf16.mxu0 %v3372_v43  ;;  %2147 = vmatprep.mubr.msk.bf16.mxu1 %vm2570_vm5, %v3402_v0  ;;  %v2863_v43 = vld [vmem:[#allocation6 + $0x84] ss:$28 sps:$4 sm:$0xff]  }
 0x120   :  { %791 = vmatpush1.bf16.msra.mxu0 %v2824_v6  ;;  %2134 = vmatpush3.bf16.msra.mxu1 %v2826_v7 }
 0x121   :  { %792 = vmatprep.subr.bf16.mxu0 %v2830_v8  ;;  %2135 = vmatprep.subr.bf16.mxu1 %v3402_v0 }
 0x124   :  { %793 = vmatpush1.bf16.msra.mxu0 %v2837_v9  ;;  %2136 = vmatpush3.bf16.msra.mxu1 %v2839_v44 }
 0x125   :  { %794 = vmatprep.subr.bf16.mxu0 %v2843_v47  ;;  %2137 = vmatprep.subr.bf16.mxu1 %v3402_v0 }
 0x128   :  { %795 = vmatpush1.bf16.msra.mxu0 %v2847_v48  ;;  %2138 = vmatpush3.bf16.msra.mxu1 %v2849_v50 }
 0x129   :  { %796 = vmatprep.subr.bf16.mxu0 %v2853_v53  ;;  %2139 = vmatprep.subr.bf16.mxu1 %v3402_v0 }
 0x12c   :  { %797 = vmatpush1.bf16.msra.mxu0 %v2857_v56  ;;  %2140 = vmatpush3.bf16.msra.mxu1 %v2859_v59 }
 0x12d   :  { %798 = vmatprep.subr.bf16.mxu0 %v2863_v43  ;;  %2141 = vmatprep.subr.bf16.mxu1 %v3402_v0 }
 0x130   :  { %799 = vmatpush1.bf16.msra.mxu0 %v2867_v1  ;;  %2142 = vmatpush3.bf16.msra.mxu1 %v2869_v62 }
 0x131   :  { %800 = vmatprep.subr.bf16.mxu0 %v2873_v60  ;;  %2143 = vmatprep.subr.bf16.mxu1 %v3402_v0 }
 0x134   :  { %801 = vmatpush1.bf16.msra.mxu0 %v2877_v58  ;;  %2144 = vmatpush3.bf16.msra.mxu1 %v2879_v57 }
 0x135   :  { %802 = vmatprep.subr.bf16.mxu0 %v2883_v55  ;;  %2145 = vmatprep.subr.bf16.mxu1 %v3402_v0  ;;  %v3448_v55 = vmov 0  }
 0x138   :  { %803 = vmatpush1.bf16.msra.mxu0 %v2887_v54  ;;  %2146 = vmatpush3.bf16.msra.mxu1 %v2889_v52 }
 0x139   :  { %910 = vmatprep.subr.bf16.mxu0 %v2666_v10  ;;  %951 = vmatprep.subr.bf16.mxu1 %v2668_v11 }
 0x13b   :  { %821 = vmatmul.mubr.bf16.vlgmr.msra.gmra.mxu0 %v353_v4  ;;  %2148 = vmatmul.mubr.bf16.vlgmr.msra.gmra.mxu1 %v353_v4  ;;  %v2931_v4 = vpop.f32.mrf.mxu1 }
 0x13c   :  { %911 = vmatpush1.bf16.msra.mxu0 %v2670_v12  ;;  %952 = vmatpush1.bf16.msra.mxu1 %v2672_v13  ;;  %3449 = vst [vmem:[#allocation43_spill] sm:$0xff] %v2931_v4 }
 0x13d   :  { %912 = vmatprep.subr.bf16.mxu0 %v2678_v14  ;;  %953 = vmatprep.subr.bf16.mxu1 %v2680_v15 }
 0x13e   :  { %942 = vmatprep.mubr.bf16.mxu0 %v3448_v55  ;;  %983 = vmatprep.mubr.bf16.mxu1 %v3448_v55 }
 0x140   :  { %913 = vmatpush1.bf16.msra.mxu0 %v2682_v16  ;;  %954 = vmatpush1.bf16.msra.mxu1 %v2684_v17 }
 0x141   :  { %914 = vmatprep.subr.bf16.mxu0 %v2690_v18  ;;  %955 = vmatprep.subr.bf16.mxu1 %v2692_v19 }
 0x144   :  { %915 = vmatpush1.bf16.msra.mxu0 %v2694_v20  ;;  %956 = vmatpush1.bf16.msra.mxu1 %v2696_v21 }
 0x145   :  { %916 = vmatprep.subr.bf16.mxu0 %v2702_v22  ;;  %957 = vmatprep.subr.bf16.mxu1 %v2704_v23 }
 0x148   :  { %917 = vmatpush1.bf16.msra.mxu0 %v2706_v24  ;;  %958 = vmatpush1.bf16.msra.mxu1 %v2708_v25 }
 0x149   :  { %918 = vmatprep.subr.bf16.mxu0 %v2714_v26  ;;  %959 = vmatprep.subr.bf16.mxu1 %v2716_v27 }
 0x14c   :  { %919 = vmatpush1.bf16.msra.mxu0 %v2718_v28  ;;  %960 = vmatpush1.bf16.msra.mxu1 %v2720_v29 }
 0x14d   :  { %920 = vmatprep.subr.bf16.mxu0 %v2726_v30  ;;  %961 = vmatprep.subr.bf16.mxu1 %v2728_v31 }
 0x150   :  { %921 = vmatpush1.bf16.msra.mxu0 %v2730_v32  ;;  %962 = vmatpush1.bf16.msra.mxu1 %v2732_v33 }
 0x151   :  { %922 = vmatprep.subr.bf16.mxu0 %v2738_v34  ;;  %963 = vmatprep.subr.bf16.mxu1 %v2740_v35  ;;  %v2933_v34 = vpop.f32.mrf.mxu1 }
 0x152   :  { %3450 = vst [vmem:[#allocation44_spill] sm:$0xff] %v2933_v34 }
 0x153   :  { %v2935_v35 = vpop.f32.mrf.mxu1 }
 0x154   :  { %923 = vmatpush1.bf16.msra.mxu0 %v2742_v36  ;;  %964 = vmatpush1.bf16.msra.mxu1 %v2744_v37  ;;  %3451 = vst [vmem:[#allocation45_spill] sm:$0xff] %v2935_v35 }
 0x155   :  { %924 = vmatprep.subr.bf16.mxu0 %v2750_v38  ;;  %965 = vmatprep.subr.bf16.mxu1 %v2752_v39  ;;  %v2937_v36 = vpop.f32.mrf.mxu1 }
 0x156   :  { %3452 = vst [vmem:[#allocation46_spill] sm:$0xff] %v2937_v36 }
 0x158   :  { %925 = vmatpush1.bf16.msra.mxu0 %v2754_v40  ;;  %966 = vmatpush1.bf16.msra.mxu1 %v2756_v41 }
 0x159   :  { %992 = vmatprep.subr.bf16.mxu0 %v2758_v42  ;;  %2151 = vmatprep.subr.bf16.mxu1 %v3402_v0 }
 0x1db   :  { %v740_v37 = vpop.f32.mrf.mxu0  ;;  %v781_v38 = vpop.f32.mrf.mxu1 }
 0x1dc   :  { %v869_v30 = vmul.f32 0.5, %v740_v37 }
 0x1dd   :  { %v742_v33 = vpop.f32.mrf.mxu0  ;;  %v783_v39 = vpop.f32.mrf.mxu1 }
 0x1de   :  { %2352 = vtanh.f32 %v869_v30  ;;  %v870_v28 = vmul.f32 0.5, %v742_v33 }
 0x1df   :  { %v744_v32 = vpop.f32.mrf.mxu0  ;;  %v785_v40 = vpop.f32.mrf.mxu1 }
 0x1e1   :  { %v745_v31 = vpop.f32.mrf.mxu0  ;;  %v786_v41 = vpop.f32.mrf.mxu1 }
 0x1eb   :  { %v2353_v42 = vpop.eup %2352 }
 0x1ec   :  { %v873_v0 = vmul.f32 0.5, %v2353_v42 }
 0x1ee   :  { %v875_v26 = vadd.f32 0.5, %v873_v0 }
 0x1f0   :  { %v877_v30 = vmul.f32 %v875_v26, %v783_v39 }
 0x1f2   :  { %v878_v41 = vadd.f32 %v877_v30, %v781_v38 }
 0x1fb   :  { %v822_v29 = vpop.f32.mrf.mxu0  ;;  %v863_v4 = vpop.f32.mrf.mxu1 }
 0x1fc   :  { %v890_v34 = vadd.f32 %v822_v29, %v2771_v49 }
 0x1fd   :  { %v824_v35 = vpop.f32.mrf.mxu0  ;;  %v2149_v27 = vpop.f32.mrf.mxu1 }
 0x1fe   :  { %v892_v36 = vmul.f32 0.5, %v890_v34  ;;  %v891_v37 = vadd.f32 %v824_v35, %v2776_v51 }
 0x1ff   :  { %v826_v25 = vpop.f32.mrf.mxu0  ;;  %v866_v24 = vpop.f32.mrf.mxu1 }
 0x200   :  { %2354 = vtanh.f32 %v892_v36  ;;  %v893_v40 = vmul.f32 0.5, %v891_v37 }
 0x201   :  { %2356 = vtanh.f32 %v870_v28  ;;  %v827_v32 = vpop.f32.mrf.mxu0  ;;  %v2150_v31 = vpop.f32.mrf.mxu1 }
 0x202   :  { %2358 = vtanh.f32 %v893_v40 }
 0x203   :  { %2360 = vtanh.f32 %v878_v41 }
 0x20d   :  { %v2355_v42 = vpop.eup %2354 }
 0x20e   :  { %v2357_v29 = vpop.eup %2356  ;;  %v896_v33 = vmul.f32 0.5, %v2355_v42 }
 0x20f   :  { %v874_v27 = vmul.f32 0.5, %v2357_v29  ;;  %v2359_v25 = vpop.eup %2358  ;;  %v3456_v29 = vld [vmem:[#allocation42_spill] sm:$0xff] }
 0x210   :  { %v898_v49 = vadd.f32 0.5, %v896_v33  ;;  %v2361_v28 = vpop.eup %2360  ;;  %v897_v26 = vmul.f32 0.5, %v2359_v25  ;;  %v3457_v33 = vld [vmem:[#allocation15_spill] sm:$0xff]  ;;  %v3463_v25 = vld [vmem:[#allocation21_spill] sm:$0xff] }
 0x211   :  { %v876_v24 = vadd.f32 0.5, %v874_v27  ;;  %v3459_v27 = vld [vmem:[#allocation17_spill] sm:$0xff] }
 0x212   :  { %v900_v34 = vmul.f32 %v898_v49, %v863_v4  ;;  %v899_v51 = vadd.f32 0.5, %v897_v26  ;;  %v3458_v49 = vld [vmem:[#allocation16_spill] sm:$0xff] }
 0x213   :  { %v881_v36 = vsub.f32 1.0, %v876_v24  ;;  %v883_v38 = vmul.f32 %v876_v24, %v2812_v61  ;;  %v3462_v24 = vld [vmem:[#allocation20_spill] sm:$0xff] }
 0x214   :  { %v901_v0 = vadd.f32 %v2797_v3, %v900_v34  ;;  %v904_v3 = vsub.f32 1.0, %v899_v51  ;;  %v3460_v34 = vld [vmem:[#allocation18_spill] sm:$0xff]  ;;  %v3466_v26 = vld [vmem:[#allocation24_spill] sm:$0xff] }
 0x215   :  { %v882_v35 = vmul.f32 %v2361_v28, %v881_v36  ;;  %v3464_v28 = vld [vmem:[#allocation22_spill] sm:$0xff]  ;;  %v3465_v36 = vld [vmem:[#allocation23_spill] sm:$0xff] }
 0x216   :  { %2362 = vtanh.f32 %v901_v0  ;;  %v3461_v0 = vld [vmem:[#allocation19_spill] sm:$0xff] }
 0x217   :  { %v884_v4 = vadd.f32 %v883_v38, %v882_v35  ;;  %v3467_v35 = vld [vmem:[#allocation25_spill] sm:$0xff]  ;;  %v3468_v38 = vld [vmem:[#allocation26_spill] sm:$0xff] }
 0x219   :  { %v885_v31 = vsel %vm880_vm9, %v884_v4, %v2812_v61  ;;  %v3455_v61 = vmov 0.0   ;;  %v3470_v4 = vld [vmem:[#allocation28_spill] sm:$0xff] }
 0x21a   :  { %v906_v30 = vmul.f32 %v899_v51, %v885_v31  ;;  %v3469_v51 = vld [vmem:[#allocation27_spill] sm:$0xff] }
 0x223   :  { %v2363_v32 = vpop.eup %2362 }
 0x224   :  { %v905_v37 = vmul.f32 %v2363_v32, %v904_v3  ;;  %v3471_v3 = vld [vmem:[#allocation29_spill] sm:$0xff]  ;;  %v3472_v32 = vld [vmem:[#allocation30_spill] sm:$0xff] }
 0x226   :  { %v907_v40 = vadd.f32 %v906_v30, %v905_v37  ;;  %v3474_v37 = vld [vmem:[#allocation32_spill] sm:$0xff]  ;;  %v3475_v30 = vld [vmem:[#allocation33_spill] sm:$0xff] }
 0x228   :  { %v2959_v41 = vsel %vm903_vm11, %v907_v40, %v885_v31  ;;  %v3473_v31 = vld [vmem:[#allocation31_spill] sm:$0xff] }
 0x229   :  { %v909_v42 = vpack.c.bf16 %v2959_v41, %v2959_v41 }
 0x22b   :  { %943 = vmatmul.mubr.bf16.vlgmr.msra.gmra.mxu0 %v909_v42  ;;  %984 = vmatmul.mubr.bf16.vlgmr.msra.gmra.mxu1 %v909_v42 }
 0x22c   :  { %993 = vmatpush1.bf16.msra.mxu0 %v2814_v63  ;;  %2152 = vmatpush3.bf16.msra.mxu1 %v2816_v2 }
 0x22d   :  { %994 = vmatprep.subr.bf16.mxu0 %v2820_v5  ;;  %2153 = vmatprep.subr.bf16.mxu1 %v3455_v61 }
 0x22e   :  { %1024 = vmatprep.mubr.bf16.mxu0 %v3448_v55  ;;  %2167 = vmatprep.mubr.msk.bf16.mxu1 %vm2570_vm5, %v3455_v61 }
 0x230   :  { %995 = vmatpush1.bf16.msra.mxu0 %v2824_v6  ;;  %2154 = vmatpush3.bf16.msra.mxu1 %v2826_v7 }
 0x231   :  { %996 = vmatprep.subr.bf16.mxu0 %v2830_v8  ;;  %2155 = vmatprep.subr.bf16.mxu1 %v3455_v61 }
 0x234   :  { %997 = vmatpush1.bf16.msra.mxu0 %v2837_v9  ;;  %2156 = vmatpush3.bf16.msra.mxu1 %v2839_v44 }
 0x235   :  { %998 = vmatprep.subr.bf16.mxu0 %v2843_v47  ;;  %2157 = vmatprep.subr.bf16.mxu1 %v3455_v61 }
 0x238   :  { %999 = vmatpush1.bf16.msra.mxu0 %v2847_v48  ;;  %2158 = vmatpush3.bf16.msra.mxu1 %v2849_v50 }
 0x239   :  { %1000 = vmatprep.subr.bf16.mxu0 %v2853_v53  ;;  %2159 = vmatprep.subr.bf16.mxu1 %v3455_v61 }
 0x23c   :  { %1001 = vmatpush1.bf16.msra.mxu0 %v2857_v56  ;;  %2160 = vmatpush3.bf16.msra.mxu1 %v2859_v59 }
 0x23d   :  { %1002 = vmatprep.subr.bf16.mxu0 %v2863_v43  ;;  %2161 = vmatprep.subr.bf16.mxu1 %v3455_v61 }
 0x240   :  { %1003 = vmatpush1.bf16.msra.mxu0 %v2867_v1  ;;  %2162 = vmatpush3.bf16.msra.mxu1 %v2869_v62 }
 0x241   :  { %1004 = vmatprep.subr.bf16.mxu0 %v2873_v60  ;;  %2163 = vmatprep.subr.bf16.mxu1 %v3455_v61 }
 0x244   :  { %1005 = vmatpush1.bf16.msra.mxu0 %v2877_v58  ;;  %2164 = vmatpush3.bf16.msra.mxu1 %v2879_v57 }
 0x245   :  { %1006 = vmatprep.subr.bf16.mxu0 %v3456_v29  ;;  %2165 = vmatprep.subr.bf16.mxu1 %v3455_v61 }
 0x248   :  { %1007 = vmatpush1.bf16.msra.mxu0 %v2887_v54  ;;  %2166 = vmatpush3.bf16.msra.mxu1 %v2889_v52 }
 0x249   :  { %1114 = vmatprep.subr.bf16.mxu0 %v2666_v10  ;;  %1155 = vmatprep.subr.bf16.mxu1 %v2668_v11 }
 0x24b   :  { %1025 = vmatmul.mubr.bf16.vlgmr.msra.gmra.mxu0 %v909_v42  ;;  %2168 = vmatmul.mubr.bf16.vlgmr.msra.gmra.mxu1 %v909_v42 }
 0x24c   :  { %1115 = vmatpush1.bf16.msra.mxu0 %v2670_v12  ;;  %1156 = vmatpush1.bf16.msra.mxu1 %v2672_v13 }
 0x24d   :  { %1116 = vmatprep.subr.bf16.mxu0 %v2678_v14  ;;  %1157 = vmatprep.subr.bf16.mxu1 %v2680_v15 }
 0x24e   :  { %1146 = vmatprep.mubr.bf16.mxu0 %v3448_v55  ;;  %1187 = vmatprep.mubr.bf16.mxu1 %v3448_v55 }
 0x250   :  { %1117 = vmatpush1.bf16.msra.mxu0 %v2682_v16  ;;  %1158 = vmatpush1.bf16.msra.mxu1 %v2684_v17 }
 0x251   :  { %1118 = vmatprep.subr.bf16.mxu0 %v2690_v18  ;;  %1159 = vmatprep.subr.bf16.mxu1 %v2692_v19 }
 0x254   :  { %1119 = vmatpush1.bf16.msra.mxu0 %v2694_v20  ;;  %1160 = vmatpush1.bf16.msra.mxu1 %v2696_v21 }
 0x255   :  { %1120 = vmatprep.subr.bf16.mxu0 %v2702_v22  ;;  %1161 = vmatprep.subr.bf16.mxu1 %v2704_v23 }
 0x258   :  { %1121 = vmatpush1.bf16.msra.mxu0 %v3457_v33  ;;  %1162 = vmatpush1.bf16.msra.mxu1 %v3458_v49 }
 0x259   :  { %1122 = vmatprep.subr.bf16.mxu0 %v3459_v27  ;;  %1163 = vmatprep.subr.bf16.mxu1 %v3460_v34 }
 0x25c   :  { %1123 = vmatpush1.bf16.msra.mxu0 %v3461_v0  ;;  %1164 = vmatpush1.bf16.msra.mxu1 %v3462_v24  ;;  %v3476_v24 = vld [vmem:[#allocation34_spill] sm:$0xff] }
 0x25d   :  { %1124 = vmatprep.subr.bf16.mxu0 %v3463_v25  ;;  %1165 = vmatprep.subr.bf16.mxu1 %v3464_v28 }
 0x260   :  { %1125 = vmatpush1.bf16.msra.mxu0 %v3465_v36  ;;  %1166 = vmatpush1.bf16.msra.mxu1 %v3466_v26 }
 0x261   :  { %1126 = vmatprep.subr.bf16.mxu0 %v3467_v35  ;;  %1167 = vmatprep.subr.bf16.mxu1 %v3468_v38 }
 0x264   :  { %1127 = vmatpush1.bf16.msra.mxu0 %v3469_v51  ;;  %1168 = vmatpush1.bf16.msra.mxu1 %v3470_v4 }
 0x265   :  { %1128 = vmatprep.subr.bf16.mxu0 %v3471_v3  ;;  %1169 = vmatprep.subr.bf16.mxu1 %v3472_v32 }
 0x268   :  { %1129 = vmatpush1.bf16.msra.mxu0 %v3473_v31  ;;  %1170 = vmatpush1.bf16.msra.mxu1 %v3474_v37 }
 0x269   :  { %1196 = vmatprep.subr.bf16.mxu0 %v3475_v30  ;;  %2171 = vmatprep.subr.bf16.mxu1 %v3455_v61 }
 0x2eb   :  { %v944_v40 = vpop.f32.mrf.mxu0  ;;  %v985_v42 = vpop.f32.mrf.mxu1 }
 0x2ec   :  { %v1073_v28 = vmul.f32 0.5, %v944_v40 }
 0x2ed   :  { %v946_v35 = vpop.f32.mrf.mxu0  ;;  %v987_v38 = vpop.f32.mrf.mxu1 }
 0x2ee   :  { %2364 = vtanh.f32 %v1073_v28  ;;  %v1074_v0 = vmul.f32 0.5, %v946_v35 }
 0x2ef   :  { %v948_v26 = vpop.f32.mrf.mxu0  ;;  %v989_v51 = vpop.f32.mrf.mxu1 }
 0x2f0   :  { %v3477_v51 = vld [vmem:[#allocation35_spill] sm:$0xff] }
 0x2f1   :  { %v949_v36 = vpop.f32.mrf.mxu0  ;;  %v990_v4 = vpop.f32.mrf.mxu1 }
 0x2fb   :  { %v2365_v3 = vpop.eup %2364 }
 0x2fc   :  { %v1077_v32 = vmul.f32 0.5, %v2365_v3 }
 0x2fe   :  { %v1079_v49 = vadd.f32 0.5, %v1077_v32  ;;  %v3478_v32 = vld [vmem:[#allocation44_spill] sm:$0xff] }
 0x300   :  { %v1081_v28 = vmul.f32 %v1079_v49, %v987_v38 }
 0x302   :  { %v1082_v3 = vadd.f32 %v1081_v28, %v985_v42 }
 0x30b   :  { %v1026_v25 = vpop.f32.mrf.mxu0  ;;  %v1067_v31 = vpop.f32.mrf.mxu1 }
 0x30c   :  { %v1094_v37 = vadd.f32 %v1026_v25, %v3476_v24 }
 0x30d   :  { %v1028_v30 = vpop.f32.mrf.mxu0  ;;  %v2169_v34 = vpop.f32.mrf.mxu1 }
 0x30e   :  { %v1096_v27 = vmul.f32 0.5, %v1094_v37  ;;  %v1095_v4 = vadd.f32 %v1028_v30, %v3477_v51 }
 0x30f   :  { %v1030_v33 = vpop.f32.mrf.mxu0  ;;  %v1070_v23 = vpop.f32.mrf.mxu1 }
 0x310   :  { %2366 = vtanh.f32 %v1096_v27  ;;  %v1097_v40 = vmul.f32 0.5, %v1095_v4 }
 0x311   :  { %2368 = vtanh.f32 %v1074_v0  ;;  %v1031_v26 = vpop.f32.mrf.mxu0  ;;  %v2170_v36 = vpop.f32.mrf.mxu1 }
 0x312   :  { %2370 = vtanh.f32 %v1097_v40 }
 0x313   :  { %2372 = vtanh.f32 %v1082_v3 }
 0x31d   :  { %v2367_v22 = vpop.eup %2366 }
 0x31e   :  { %v2369_v24 = vpop.eup %2368  ;;  %v1100_v25 = vmul.f32 0.5, %v2367_v22 }
 0x31f   :  { %v1078_v34 = vmul.f32 0.5, %v2369_v24  ;;  %v2371_v27 = vpop.eup %2370 }
 0x320   :  { %v1102_v35 = vadd.f32 0.5, %v1100_v25  ;;  %v2373_v0 = vpop.eup %2372  ;;  %v1101_v36 = vmul.f32 0.5, %v2371_v27  ;;  %v3492_v25 = vld [vmem:[#allocation26_spill] sm:$0xff]  ;;  %v3499_v27 = vld [vmem:[#allocation33_spill] sm:$0xff] }
 0x321   :  { %v1080_v23 = vadd.f32 0.5, %v1078_v34  ;;  %v3494_v34 = vld [vmem:[#allocation28_spill] sm:$0xff] }
 0x322   :  { %v1104_v37 = vmul.f32 %v1102_v35, %v1067_v31  ;;  %v1103_v38 = vadd.f32 0.5, %v1101_v36  ;;  %v3493_v35 = vld [vmem:[#allocation27_spill] sm:$0xff] }
 0x323   :  { %v1085_v26 = vsub.f32 1.0, %v1080_v23  ;;  %v1087_v49 = vmul.f32 %v1080_v23, %v2959_v41  ;;  %v3498_v23 = vld [vmem:[#allocation32_spill] sm:$0xff] }
 0x324   :  { %v1105_v33 = vadd.f32 %v1104_v37, %v3478_v32  ;;  %v1108_v22 = vsub.f32 1.0, %v1103_v38  ;;  %v3495_v37 = vld [vmem:[#allocation29_spill] sm:$0xff]  ;;  %v3496_v32 = vld [vmem:[#allocation30_spill] sm:$0xff] }
 0x325   :  { %v1086_v30 = vmul.f32 %v2373_v0, %v1085_v26 }
 0x326   :  { %2374 = vtanh.f32 %v1105_v33  ;;  %v3497_v33 = vld [vmem:[#allocation31_spill] sm:$0xff] }
 0x327   :  { %v1088_v42 = vadd.f32 %v1087_v49, %v1086_v30 }
 0x329   :  { %v1089_v51 = vsel %vm1084_vm12, %v1088_v42, %v2959_v41  ;;  %v3491_v41 = vld [vmem:[#allocation25_spill] sm:$0xff] }
 0x32a   :  { %v1110_v28 = vmul.f32 %v1103_v38, %v1089_v51 }
 0x333   :  { %v2375_v31 = vpop.eup %2374 }
 0x334   :  { %v1109_v4 = vmul.f32 %v2375_v31, %v1108_v22 }
 0x336   :  { %v1111_v40 = vadd.f32 %v1110_v28, %v1109_v4 }
 0x338   :  { %v3046_v3 = vsel %vm1107_vm14, %v1111_v40, %v1089_v51 }
 0x339   :  { %v1113_v24 = vpack.c.bf16 %v3046_v3, %v3046_v3 }
 0x33b   :  { %1147 = vmatmul.mubr.bf16.vlgmr.msra.gmra.mxu0 %v1113_v24  ;;  %1188 = vmatmul.mubr.bf16.vlgmr.msra.gmra.mxu1 %v1113_v24 }
 0x33c   :  { %1197 = vmatpush1.bf16.msra.mxu0 %v2814_v63  ;;  %2172 = vmatpush3.bf16.msra.mxu1 %v2816_v2 }
 0x33d   :  { %1198 = vmatprep.subr.bf16.mxu0 %v2820_v5  ;;  %2173 = vmatprep.subr.bf16.mxu1 %v3455_v61 }
 0x33e   :  { %1228 = vmatprep.mubr.bf16.mxu0 %v3448_v55  ;;  %2187 = vmatprep.mubr.msk.bf16.mxu1 %vm2570_vm5, %v3455_v61 }
 0x340   :  { %1199 = vmatpush1.bf16.msra.mxu0 %v2824_v6  ;;  %2174 = vmatpush3.bf16.msra.mxu1 %v2826_v7 }
 0x341   :  { %1200 = vmatprep.subr.bf16.mxu0 %v2830_v8  ;;  %2175 = vmatprep.subr.bf16.mxu1 %v3455_v61 }
 0x344   :  { %1201 = vmatpush1.bf16.msra.mxu0 %v2837_v9  ;;  %2176 = vmatpush3.bf16.msra.mxu1 %v2839_v44 }
 0x345   :  { %1202 = vmatprep.subr.bf16.mxu0 %v2843_v47  ;;  %2177 = vmatprep.subr.bf16.mxu1 %v3455_v61 }
 0x348   :  { %1203 = vmatpush1.bf16.msra.mxu0 %v2847_v48  ;;  %2178 = vmatpush3.bf16.msra.mxu1 %v2849_v50 }
 0x349   :  { %1204 = vmatprep.subr.bf16.mxu0 %v2853_v53  ;;  %2179 = vmatprep.subr.bf16.mxu1 %v3455_v61 }
 0x34c   :  { %1205 = vmatpush1.bf16.msra.mxu0 %v2857_v56  ;;  %2180 = vmatpush3.bf16.msra.mxu1 %v2859_v59 }
 0x34d   :  { %1206 = vmatprep.subr.bf16.mxu0 %v2863_v43  ;;  %2181 = vmatprep.subr.bf16.mxu1 %v3455_v61 }
 0x350   :  { %1207 = vmatpush1.bf16.msra.mxu0 %v2867_v1  ;;  %2182 = vmatpush3.bf16.msra.mxu1 %v2869_v62 }
 0x351   :  { %1208 = vmatprep.subr.bf16.mxu0 %v2873_v60  ;;  %2183 = vmatprep.subr.bf16.mxu1 %v3455_v61 }
 0x354   :  { %1209 = vmatpush1.bf16.msra.mxu0 %v2877_v58  ;;  %2184 = vmatpush3.bf16.msra.mxu1 %v2879_v57 }
 0x355   :  { %1210 = vmatprep.subr.bf16.mxu0 %v3456_v29  ;;  %2185 = vmatprep.subr.bf16.mxu1 %v3455_v61 }
 0x358   :  { %1211 = vmatpush1.bf16.msra.mxu0 %v2887_v54  ;;  %2186 = vmatpush3.bf16.msra.mxu1 %v2889_v52 }
 0x359   :  { %1318 = vmatprep.subr.bf16.mxu0 %v2666_v10  ;;  %1359 = vmatprep.subr.bf16.mxu1 %v2668_v11  ;;  %v3479_v10 = vld [vmem:[#allocation13_spill] sm:$0xff]  ;;  %v3480_v11 = vld [vmem:[#allocation14_spill] sm:$0xff] }
 0x35b   :  { %1229 = vmatmul.mubr.bf16.vlgmr.msra.gmra.mxu0 %v1113_v24  ;;  %2188 = vmatmul.mubr.bf16.vlgmr.msra.gmra.mxu1 %v1113_v24  ;;  %v3500_v24 = vld [vmem:[#allocation36_spill] sm:$0xff] }
 0x35c   :  { %1319 = vmatpush1.bf16.msra.mxu0 %v2670_v12  ;;  %1360 = vmatpush1.bf16.msra.mxu1 %v2672_v13  ;;  %v3481_v12 = vld [vmem:[#allocation15_spill] sm:$0xff]  ;;  %v3482_v13 = vld [vmem:[#allocation16_spill] sm:$0xff] }
 0x35d   :  { %1320 = vmatprep.subr.bf16.mxu0 %v2678_v14  ;;  %1361 = vmatprep.subr.bf16.mxu1 %v2680_v15  ;;  %v3483_v14 = vld [vmem:[#allocation17_spill] sm:$0xff]  ;;  %v3484_v15 = vld [vmem:[#allocation18_spill] sm:$0xff] }
 0x35e   :  { %1350 = vmatprep.mubr.bf16.mxu0 %v3448_v55  ;;  %1391 = vmatprep.mubr.bf16.mxu1 %v3448_v55 }
 0x360   :  { %1321 = vmatpush1.bf16.msra.mxu0 %v2682_v16  ;;  %1362 = vmatpush1.bf16.msra.mxu1 %v2684_v17  ;;  %v3485_v16 = vld [vmem:[#allocation19_spill] sm:$0xff]  ;;  %v3486_v17 = vld [vmem:[#allocation20_spill] sm:$0xff] }
 0x361   :  { %1322 = vmatprep.subr.bf16.mxu0 %v2690_v18  ;;  %1363 = vmatprep.subr.bf16.mxu1 %v2692_v19  ;;  %v3487_v18 = vld [vmem:[#allocation21_spill] sm:$0xff]  ;;  %v3488_v19 = vld [vmem:[#allocation22_spill] sm:$0xff] }
 0x364   :  { %1323 = vmatpush1.bf16.msra.mxu0 %v2694_v20  ;;  %1364 = vmatpush1.bf16.msra.mxu1 %v2696_v21  ;;  %v3489_v20 = vld [vmem:[#allocation23_spill] sm:$0xff]  ;;  %v3490_v21 = vld [vmem:[#allocation24_spill] sm:$0xff] }
 0x365   :  { %1324 = vmatprep.subr.bf16.mxu0 %v3479_v10  ;;  %1365 = vmatprep.subr.bf16.mxu1 %v3480_v11 }
 0x368   :  { %1325 = vmatpush1.bf16.msra.mxu0 %v3481_v12  ;;  %1366 = vmatpush1.bf16.msra.mxu1 %v3482_v13 }
 0x369   :  { %1326 = vmatprep.subr.bf16.mxu0 %v3483_v14  ;;  %1367 = vmatprep.subr.bf16.mxu1 %v3484_v15 }
 0x36c   :  { %1327 = vmatpush1.bf16.msra.mxu0 %v3485_v16  ;;  %1368 = vmatpush1.bf16.msra.mxu1 %v3486_v17 }
 0x36d   :  { %1328 = vmatprep.subr.bf16.mxu0 %v3487_v18  ;;  %1369 = vmatprep.subr.bf16.mxu1 %v3488_v19 }
 0x370   :  { %1329 = vmatpush1.bf16.msra.mxu0 %v3489_v20  ;;  %1370 = vmatpush1.bf16.msra.mxu1 %v3490_v21  ;;  %v3501_v20 = vld [vmem:[#allocation37_spill] sm:$0xff] }
 0x371   :  { %1330 = vmatprep.subr.bf16.mxu0 %v3491_v41  ;;  %1371 = vmatprep.subr.bf16.mxu1 %v3492_v25 }
 0x374   :  { %1331 = vmatpush1.bf16.msra.mxu0 %v3493_v35  ;;  %1372 = vmatpush1.bf16.msra.mxu1 %v3494_v34 }
 0x375   :  { %1332 = vmatprep.subr.bf16.mxu0 %v3495_v37  ;;  %1373 = vmatprep.subr.bf16.mxu1 %v3496_v32 }
 0x378   :  { %1333 = vmatpush1.bf16.msra.mxu0 %v3497_v33  ;;  %1374 = vmatpush1.bf16.msra.mxu1 %v3498_v23 }
 0x379   :  { %1400 = vmatprep.subr.bf16.mxu0 %v3499_v27  ;;  %2191 = vmatprep.subr.bf16.mxu1 %v3455_v61 }
 0x3fb   :  { %v1148_v0 = vpop.f32.mrf.mxu0  ;;  %v1189_v26 = vpop.f32.mrf.mxu1 }
 0x3fc   :  { %v1277_v31 = vmul.f32 0.5, %v1148_v0  ;;  %v3502_v0 = vld [vmem:[#allocation43_spill] sm:$0xff] }
 0x3fd   :  { %v1150_v36 = vpop.f32.mrf.mxu0  ;;  %v1191_v30 = vpop.f32.mrf.mxu1 }
 0x3fe   :  { %2376 = vtanh.f32 %v1277_v31  ;;  %v1278_v11 = vmul.f32 0.5, %v1150_v36 }
 0x3ff   :  { %v1152_v49 = vpop.f32.mrf.mxu0  ;;  %v1193_v38 = vpop.f32.mrf.mxu1 }
 0x401   :  { %v1153_v42 = vpop.f32.mrf.mxu0  ;;  %v1194_v22 = vpop.f32.mrf.mxu1 }
 0x40b   :  { %v2377_v51 = vpop.eup %2376 }
 0x40c   :  { %v1281_v4 = vmul.f32 0.5, %v2377_v51 }
 0x40e   :  { %v1283_v15 = vadd.f32 0.5, %v1281_v4 }
 0x410   :  { %v1285_v41 = vmul.f32 %v1283_v15, %v1191_v30  ;;  %v3244_v15 = vld [vmem:[#allocation6 + $0x3c] ss:$28 sps:$4 sm:$0xff]  }
 0x412   :  { %v1286_v35 = vadd.f32 %v1285_v41, %v1189_v26  ;;  %v3265_v41 = vld [vmem:[#allocation6 + $0x8] ss:$28 sps:$4 sm:$0xff]  }
 0x41b   :  { %v1230_v28 = vpop.f32.mrf.mxu0  ;;  %v1271_v40 = vpop.f32.mrf.mxu1 }
 0x41c   :  { %v1298_v10 = vadd.f32 %v1230_v28, %v3500_v24 }
 0x41d   :  { %v1232_v12 = vpop.f32.mrf.mxu0  ;;  %v2189_v13 = vpop.f32.mrf.mxu1 }
 0x41e   :  { %v1300_v14 = vmul.f32 0.5, %v1298_v10  ;;  %v1299_v21 = vadd.f32 %v1232_v12, %v3501_v20  ;;  %v3259_v20 = vld [vmem:[#allocation6 + $0xc] ss:$28 sps:$4 sm:$0xff]  }
 0x41f   :  { %v1234_v16 = vpop.f32.mrf.mxu0  ;;  %v1274_v17 = vpop.f32.mrf.mxu1 }
 0x420   :  { %2378 = vtanh.f32 %v1300_v14  ;;  %v1301_v25 = vmul.f32 0.5, %v1299_v21  ;;  %v3247_v16 = vld [vmem:[#allocation6 + $0x44] ss:$28 sps:$4 sm:$0xff]   ;;  %v3250_v17 = vld [vmem:[#allocation6 + $0x38] ss:$28 sps:$4 sm:$0xff]  }
 0x421   :  { %2380 = vtanh.f32 %v1278_v11  ;;  %v1235_v18 = vpop.f32.mrf.mxu0  ;;  %v2190_v19 = vpop.f32.mrf.mxu1  ;;  %v3262_v21 = vld [vmem:[#allocation6] ss:$28 sps:$4 sm:$0xff]  }
 0x422   :  { %2382 = vtanh.f32 %v1301_v25  ;;  %v3253_v18 = vld [vmem:[#allocation6 + $0x40] ss:$28 sps:$4 sm:$0xff]  }
 0x423   :  { %2384 = vtanh.f32 %v1286_v35  ;;  %v3256_v19 = vld [vmem:[#allocation6 + $0x4] ss:$28 sps:$4 sm:$0xff]   ;;  %v2450_v25 = vld [vmem:[#allocation6 + $0x19c] ss:$28 sps:$4 sm:$0xff]  }
 0x42d   :  { %v2379_v34 = vpop.eup %2378 }
 0x42e   :  { %v2381_v37 = vpop.eup %2380  ;;  %v1304_v32 = vmul.f32 0.5, %v2379_v34 }
 0x42f   :  { %v1282_v23 = vmul.f32 0.5, %v2381_v37  ;;  %v2383_v38 = vpop.eup %2382 }
 0x430   :  { %v1306_v33 = vadd.f32 0.5, %v1304_v32  ;;  %v2385_v42 = vpop.eup %2384  ;;  %v1305_v31 = vmul.f32 0.5, %v2383_v38 }
 0x431   :  { %v1284_v49 = vadd.f32 0.5, %v1282_v23 }
 0x432   :  { %v1308_v27 = vmul.f32 %v1306_v33, %v1271_v40  ;;  %v1307_v26 = vadd.f32 0.5, %v1305_v31  ;;  %v3503_v31 = vld [vmem:[#allocation38_spill] sm:$0xff] }
 0x433   :  { %v1289_v22 = vsub.f32 1.0, %v1284_v49  ;;  %v1291_v30 = vmul.f32 %v1284_v49, %v3046_v3 }
 0x434   :  { %v1309_v36 = vadd.f32 %v3502_v0, %v1308_v27  ;;  %v1312_v28 = vsub.f32 1.0, %v1307_v26 }
 0x435   :  { %v1290_v51 = vmul.f32 %v2385_v42, %v1289_v22 }
 0x436   :  { %2386 = vtanh.f32 %v1309_v36 }
 0x437   :  { %v1292_v4 = vadd.f32 %v1291_v30, %v1290_v51 }
 0x439   :  { %v1293_v24 = vsel %vm1288_vm15, %v1292_v4, %v3046_v3  ;;  %v3241_v3 = vld [vmem:[#allocation6 + $0x78] ss:$28 sps:$4 sm:$0xff]  }
 0x43a   :  { %v1314_v11 = vmul.f32 %v1307_v26, %v1293_v24 }
 0x443   :  { %v2387_v40 = vpop.eup %2386 }
 0x444   :  { %v1313_v10 = vmul.f32 %v2387_v40, %v1312_v28 }
 0x446   :  { %v1315_v12 = vadd.f32 %v1314_v11, %v1313_v10 }
 0x448   :  { %v3133_v13 = vsel %vm1311_vm1, %v1315_v12, %v1293_v24 }
 0x449   :  { %v1317_v14 = vpack.c.bf16 %v3133_v13, %v3133_v13 }
 0x44b   :  { %1351 = vmatmul.mubr.bf16.vlgmr.msra.gmra.mxu0 %v1317_v14  ;;  %1392 = vmatmul.mubr.bf16.vlgmr.msra.gmra.mxu1 %v1317_v14 }
 0x44c   :  { %1401 = vmatpush1.bf16.msra.mxu0 %v2814_v63  ;;  %2192 = vmatpush3.bf16.msra.mxu1 %v2816_v2  ;;  %v3196_v63 = vld [vmem:[#allocation6 + $0x11c] ss:$28 sps:$4 sm:$0xff]   ;;  %v3199_v2 = vld [vmem:[#allocation6 + $0x124] ss:$28 sps:$4 sm:$0xff]  }
 0x44d   :  { %1402 = vmatprep.subr.bf16.mxu0 %v2820_v5  ;;  %2193 = vmatprep.subr.bf16.mxu1 %v3455_v61  ;;  %v3202_v5 = vld [vmem:[#allocation6 + $0x118] ss:$28 sps:$4 sm:$0xff]  }
 0x44e   :  { %1432 = vmatprep.mubr.bf16.mxu0 %v3448_v55  ;;  %2207 = vmatprep.mubr.msk.bf16.mxu1 %vm2570_vm5, %v3455_v61 }
 0x450   :  { %1403 = vmatpush1.bf16.msra.mxu0 %v2824_v6  ;;  %2194 = vmatpush3.bf16.msra.mxu1 %v2826_v7  ;;  %v3205_v6 = vld [vmem:[#allocation6 + $0x120] ss:$28 sps:$4 sm:$0xff]  }
 0x451   :  { %1404 = vmatprep.subr.bf16.mxu0 %v2830_v8  ;;  %2195 = vmatprep.subr.bf16.mxu1 %v3455_v61  ;;  %v3208_v7 = vld [vmem:[#allocation6 + $0xe4] ss:$28 sps:$4 sm:$0xff]   ;;  %v3211_v8 = vld [vmem:[#allocation6 + $0xec] ss:$28 sps:$4 sm:$0xff]  }
 0x454   :  { %1405 = vmatpush1.bf16.msra.mxu0 %v2837_v9  ;;  %2196 = vmatpush3.bf16.msra.mxu1 %v2839_v44  ;;  %v3214_v9 = vld [vmem:[#allocation6 + $0xe0] ss:$28 sps:$4 sm:$0xff]   ;;  %v3217_v44 = vld [vmem:[#allocation6 + $0xe8] ss:$28 sps:$4 sm:$0xff]  }
 0x455   :  { %1406 = vmatprep.subr.bf16.mxu0 %v2843_v47  ;;  %2197 = vmatprep.subr.bf16.mxu1 %v3455_v61  ;;  %v3220_v47 = vld [vmem:[#allocation6 + $0xac] ss:$28 sps:$4 sm:$0xff]  }
 0x458   :  { %1407 = vmatpush1.bf16.msra.mxu0 %v2847_v48  ;;  %2198 = vmatpush3.bf16.msra.mxu1 %v2849_v50  ;;  %v3223_v48 = vld [vmem:[#allocation6 + $0xb4] ss:$28 sps:$4 sm:$0xff]   ;;  %v3226_v50 = vld [vmem:[#allocation6 + $0xa8] ss:$28 sps:$4 sm:$0xff]  }
 0x459   :  { %1408 = vmatprep.subr.bf16.mxu0 %v2853_v53  ;;  %2199 = vmatprep.subr.bf16.mxu1 %v3455_v61  ;;  %v3229_v53 = vld [vmem:[#allocation6 + $0xb0] ss:$28 sps:$4 sm:$0xff]  }
 0x45c   :  { %1409 = vmatpush1.bf16.msra.mxu0 %v2857_v56  ;;  %2200 = vmatpush3.bf16.msra.mxu1 %v2859_v59  ;;  %v3232_v56 = vld [vmem:[#allocation6 + $0x74] ss:$28 sps:$4 sm:$0xff]   ;;  %v3235_v59 = vld [vmem:[#allocation6 + $0x7c] ss:$28 sps:$4 sm:$0xff]  }
 0x45d   :  { %1410 = vmatprep.subr.bf16.mxu0 %v2863_v43  ;;  %2201 = vmatprep.subr.bf16.mxu1 %v3455_v61  ;;  %v3170_v43 = vld [vmem:[#allocation6 + $0x18c] ss:$28 sps:$4 sm:$0xff]  }
 0x460   :  { %1411 = vmatpush1.bf16.msra.mxu0 %v2867_v1  ;;  %2202 = vmatpush3.bf16.msra.mxu1 %v2869_v62  ;;  %v3173_v62 = vld [vmem:[#allocation6 + $0x194] ss:$28 sps:$4 sm:$0xff]  }
 0x461   :  { %1412 = vmatprep.subr.bf16.mxu0 %v2873_v60  ;;  %2203 = vmatprep.subr.bf16.mxu1 %v3455_v61  ;;  %v3190_v60 = vld [vmem:[#allocation6 + $0x150] ss:$28 sps:$4 sm:$0xff]   ;;  %v3193_v1 = vld [vmem:[#allocation6 + $0x158] ss:$28 sps:$4 sm:$0xff]  }
 0x464   :  { %1413 = vmatpush1.bf16.msra.mxu0 %v2877_v58  ;;  %2204 = vmatpush3.bf16.msra.mxu1 %v2879_v57  ;;  %v3176_v58 = vld [vmem:[#allocation6 + $0x188] ss:$28 sps:$4 sm:$0xff]   ;;  %v3179_v57 = vld [vmem:[#allocation6 + $0x190] ss:$28 sps:$4 sm:$0xff]  }
 0x465   :  { %1414 = vmatprep.subr.bf16.mxu0 %v3456_v29  ;;  %2205 = vmatprep.subr.bf16.mxu1 %v3455_v61  ;;  %v3238_v29 = vld [vmem:[#allocation6 + $0x70] ss:$28 sps:$4 sm:$0xff]  }
 0x468   :  { %1415 = vmatpush1.bf16.msra.mxu0 %v2887_v54  ;;  %2206 = vmatpush3.bf16.msra.mxu1 %v2889_v52  ;;  %v3182_v54 = vld [vmem:[#allocation6 + $0x154] ss:$28 sps:$4 sm:$0xff]   ;;  %v3185_v52 = vld [vmem:[#allocation6 + $0x15c] ss:$28 sps:$4 sm:$0xff]  }
 0x469   :  { %1522 = vmatprep.subr.bf16.mxu0 %v3170_v43  ;;  %1563 = vmatprep.subr.bf16.mxu1 %v3173_v62 }
 0x46b   :  { %1433 = vmatmul.mubr.bf16.vlgmr.msra.gmra.mxu0 %v1317_v14  ;;  %2208 = vmatmul.mubr.bf16.vlgmr.msra.gmra.mxu1 %v1317_v14  ;;  %v3504_v14 = vld [vmem:[#allocation39_spill] sm:$0xff] }
 0x46c   :  { %1523 = vmatpush1.bf16.msra.mxu0 %v3176_v58  ;;  %1564 = vmatpush1.bf16.msra.mxu1 %v3179_v57 }
 0x46d   :  { %1524 = vmatprep.subr.bf16.mxu0 %v3182_v54  ;;  %1565 = vmatprep.subr.bf16.mxu1 %v3185_v52 }
 0x46e   :  { %1554 = vmatprep.mubr.bf16.mxu0 %v3448_v55  ;;  %1595 = vmatprep.mubr.bf16.mxu1 %v3448_v55 }
 0x470   :  { %1525 = vmatpush1.bf16.msra.mxu0 %v3190_v60  ;;  %1566 = vmatpush1.bf16.msra.mxu1 %v3193_v1 }
 0x471   :  { %1526 = vmatprep.subr.bf16.mxu0 %v3196_v63  ;;  %1567 = vmatprep.subr.bf16.mxu1 %v3199_v2 }
 0x474   :  { %1527 = vmatpush1.bf16.msra.mxu0 %v3202_v5  ;;  %1568 = vmatpush1.bf16.msra.mxu1 %v3205_v6 }
 0x475   :  { %1528 = vmatprep.subr.bf16.mxu0 %v3208_v7  ;;  %1569 = vmatprep.subr.bf16.mxu1 %v3211_v8 }
 0x478   :  { %1529 = vmatpush1.bf16.msra.mxu0 %v3214_v9  ;;  %1570 = vmatpush1.bf16.msra.mxu1 %v3217_v44 }
 0x479   :  { %1530 = vmatprep.subr.bf16.mxu0 %v3220_v47  ;;  %1571 = vmatprep.subr.bf16.mxu1 %v3223_v48 }
 0x47c   :  { %1531 = vmatpush1.bf16.msra.mxu0 %v3226_v50  ;;  %1572 = vmatpush1.bf16.msra.mxu1 %v3229_v53 }
 0x47d   :  { %1532 = vmatprep.subr.bf16.mxu0 %v3232_v56  ;;  %1573 = vmatprep.subr.bf16.mxu1 %v3235_v59 }
 0x480   :  { %1533 = vmatpush1.bf16.msra.mxu0 %v3238_v29  ;;  %1574 = vmatpush1.bf16.msra.mxu1 %v3241_v3 }
 0x481   :  { %1534 = vmatprep.subr.bf16.mxu0 %v3244_v15  ;;  %1575 = vmatprep.subr.bf16.mxu1 %v3247_v16 }
 0x484   :  { %1535 = vmatpush1.bf16.msra.mxu0 %v3250_v17  ;;  %1576 = vmatpush1.bf16.msra.mxu1 %v3253_v18 }
 0x485   :  { %1536 = vmatprep.subr.bf16.mxu0 %v3256_v19  ;;  %1577 = vmatprep.subr.bf16.mxu1 %v3259_v20 }
 0x488   :  { %1537 = vmatpush1.bf16.msra.mxu0 %v3262_v21  ;;  %1578 = vmatpush1.bf16.msra.mxu1 %v3265_v41 }
 0x489   :  { %1604 = vmatprep.subr.bf16.mxu0 %v2450_v25  ;;  %2211 = vmatprep.subr.bf16.mxu1 %v3455_v61 }
 0x50b   :  { %v1352_v35 = vpop.f32.mrf.mxu0  ;;  %v1393_v34 = vpop.f32.mrf.mxu1 }
 0x50c   :  { %v1481_v36 = vmul.f32 0.5, %v1352_v35 }
 0x50d   :  { %v1354_v37 = vpop.f32.mrf.mxu0  ;;  %v1395_v32 = vpop.f32.mrf.mxu1 }
 0x50e   :  { %2388 = vtanh.f32 %v1481_v36  ;;  %v1482_v30 = vmul.f32 0.5, %v1354_v37 }
 0x50f   :  { %v1356_v33 = vpop.f32.mrf.mxu0  ;;  %v1397_v23 = vpop.f32.mrf.mxu1 }
 0x511   :  { %v1357_v27 = vpop.f32.mrf.mxu0  ;;  %v1398_v0 = vpop.f32.mrf.mxu1 }
 0x51b   :  { %v2389_v49 = vpop.eup %2388 }
 0x51c   :  { %v1485_v38 = vmul.f32 0.5, %v2389_v49 }
 0x51e   :  { %v1487_v40 = vadd.f32 0.5, %v1485_v38  ;;  %v3505_v38 = vld [vmem:[#allocation46_spill] sm:$0xff] }
 0x520   :  { %v1489_v35 = vmul.f32 %v1487_v40, %v1395_v32 }
 0x522   :  { %v1490_v23 = vadd.f32 %v1489_v35, %v1393_v34 }
 0x52b   :  { %v1434_v42 = vpop.f32.mrf.mxu0  ;;  %v1475_v22 = vpop.f32.mrf.mxu1 }
 0x52c   :  { %v1502_v51 = vadd.f32 %v1434_v42, %v3503_v31 }
 0x52d   :  { %v1436_v26 = vpop.f32.mrf.mxu0  ;;  %v2209_v4 = vpop.f32.mrf.mxu1 }
 0x52e   :  { %v1504_v28 = vmul.f32 0.5, %v1502_v51  ;;  %v1503_v25 = vadd.f32 %v1436_v26, %v3504_v14 }
 0x52f   :  { %v1438_v24 = vpop.f32.mrf.mxu0  ;;  %v1478_v10 = vpop.f32.mrf.mxu1 }
 0x530   :  { %2390 = vtanh.f32 %v1504_v28  ;;  %v1505_v33 = vmul.f32 0.5, %v1503_v25 }
 0x531   :  { %2392 = vtanh.f32 %v1482_v30  ;;  %v1439_v11 = vpop.f32.mrf.mxu0  ;;  %v2210_v12 = vpop.f32.mrf.mxu1 }
 0x532   :  { %2394 = vtanh.f32 %v1505_v33 }
 0x533   :  { %2396 = vtanh.f32 %v1490_v23  ;;  %v2452_v23 = vld [vmem:[#allocation6 + $0x198] ss:$28 sps:$4 sm:$0xff]  }
 0x53d   :  { %v2391_v27 = vpop.eup %2390 }
 0x53e   :  { %v2393_v0 = vpop.eup %2392  ;;  %v1508_v37 = vmul.f32 0.5, %v2391_v27  ;;  %v2453_v27 = vld [vmem:[#allocation6 + $0x1a0] ss:$28 sps:$4 sm:$0xff]  }
 0x53f   :  { %v1486_v49 = vmul.f32 0.5, %v2393_v0  ;;  %v2395_v30 = vpop.eup %2394  ;;  %v2455_v0 = vld [vmem:[#allocation6 + $0x160] ss:$28 sps:$4 sm:$0xff]  }
 0x540   :  { %v1510_v36 = vadd.f32 0.5, %v1508_v37  ;;  %v2397_v4 = vpop.eup %2396  ;;  %v1509_v24 = vmul.f32 0.5, %v2395_v30  ;;  %v2456_v37 = vld [vmem:[#allocation6 + $0x168] ss:$28 sps:$4 sm:$0xff]   ;;  %v2463_v30 = vld [vmem:[#allocation6 + $0xbc] ss:$28 sps:$4 sm:$0xff]  }
 0x541   :  { %v1488_v51 = vadd.f32 0.5, %v1486_v49  ;;  %v2458_v49 = vld [vmem:[#allocation6 + $0x128] ss:$28 sps:$4 sm:$0xff]  }
 0x542   :  { %v1512_v42 = vmul.f32 %v1510_v36, %v1475_v22  ;;  %v1511_v34 = vadd.f32 0.5, %v1509_v24  ;;  %v3280_v22 = vld [vmem:[%s3365_s1] sm:$0xff]  ;;  %v2457_v36 = vld [vmem:[#allocation6 + $0x12c] ss:$28 sps:$4 sm:$0xff]   ;;  %v2466_v24 = vld [vmem:[#allocation6 + $0x84] ss:$28 sps:$4 sm:$0xff]  }
 0x543   :  { %v1493_v28 = vsub.f32 1.0, %v1488_v51  ;;  %v1495_v32 = vmul.f32 %v1488_v51, %v3133_v13  ;;  %vm1498_vm4 = vcmp.gt.s32.totalorder %v3280_v22, 4  ;;  %v2462_v51 = vld [vmem:[#allocation6 + $0xf8] ss:$28 sps:$4 sm:$0xff]   ;;  %vm1702_vm7 = vcmp.gt.s32.totalorder %v3280_v22, 5  ;;  %s2571_s1 = smov [#allocation9]  }
 0x544   :  { %v1513_v31 = vadd.f32 %v1512_v42, %v3505_v38  ;;  %v1516_v10 = vsub.f32 1.0, %v1511_v34  ;;  %vm1515_vm6 = vmand %vm1498_vm4, %vm321_vm2  ;;  %v2459_v42 = vld [vmem:[#allocation6 + $0x130] ss:$28 sps:$4 sm:$0xff]   ;;  %s1971_s18 = sshll.u32 %s2571_s1, 4  ;;  %s1972_s18 = int_to_ptr.vmem [resolvable:$true] %s1971_s18 }
 0x545   :  { %v1494_v26 = vmul.f32 %v2397_v4, %v1493_v28  ;;  %v2460_v38 = vld [vmem:[#allocation6 + $0xf4] ss:$28 sps:$4 sm:$0xff]   ;;  %v2465_v28 = vld [vmem:[#allocation6 + $0xc0] ss:$28 sps:$4 sm:$0xff]   ;;  %vm1719_vm9 = vmand %vm1702_vm7, %vm321_vm2  ;;  %s2535_s2 = scalar_lea.vmem %s1972_s18, 256  ;;  %p2540_p2 = scmp.lt.s32.totalorder %s1972_s18, %s1972_s18 }
 0x546   :  { %2398 = vtanh.f32 %v1513_v31  ;;  %v2461_v31 = vld [vmem:[#allocation6 + $0xf0] ss:$28 sps:$4 sm:$0xff]   ;;  %v2464_v4 = vld [vmem:[#allocation6 + $0xb8] ss:$28 sps:$4 sm:$0xff]   ;;  %vm1819_vm2 = vmand %vm1702_vm7, %vm2945_vm8  ;;  %p2536_p1 = scmp.ne.s32.totalorder %s1972_s18, %s2535_s2  ;;  %p2541_p3 = scmp.lt.s32.totalorder %s2535_s2, %s2535_s2 }
 0x547   :  { %v1496_v40 = vadd.f32 %v1495_v32, %v1494_v26  ;;  %v2467_v26 = vld [vmem:[#allocation6 + $0x80] ss:$28 sps:$4 sm:$0xff]   ;;  %v2468_v32 = vld [vmem:[#allocation6 + $0x88] ss:$28 sps:$4 sm:$0xff]  }
 0x548   :  { %p2542_p4 = por %p2541_p3, %p2540_p2 }
 0x549   :  { %v1497_v12 = vsel %vm1492_vm3, %v1496_v40, %v3133_v13  ;;  %v2454_v13 = vld [vmem:[#allocation6 + $0x164] ss:$28 sps:$4 sm:$0xff]  }
 0x54a   :  { %v1518_v25 = vmul.f32 %v1511_v34, %v1497_v12  ;;  %v2469_v34 = vld [vmem:[#allocation6 + $0x4c] ss:$28 sps:$4 sm:$0xff]   ;;  %p2543_p5 = pnand %p2542_p4, %p2536_p1 }
 0x54b   :  { %v2470_v40 = vld [vmem:[#allocation6 + $0x48] ss:$28 sps:$4 sm:$0xff]  }
 0x553   :  { %v2399_v11 = vpop.eup %2398 }
 0x554   :  { %v1517_v14 = vmul.f32 %v2399_v11, %v1516_v10  ;;  %v2471_v10 = vld [vmem:[#allocation6 + $0x50] ss:$28 sps:$4 sm:$0xff]  }
 0x555   :  { %v2472_v11 = vld [vmem:[#allocation6 + $0x14] ss:$28 sps:$4 sm:$0xff]  }
 0x556   :  { %v1519_v46 = vadd.f32 %v1518_v25, %v1517_v14  ;;  %v2474_v14 = vld [vmem:[#allocation6 + $0x18] ss:$28 sps:$4 sm:$0xff]  }
 0x558   :  { %v3288_v35 = vsel %vm1515_vm6, %v1519_v46, %v1497_v12  ;;  %v2473_v12 = vld [vmem:[#allocation6 + $0x10] ss:$28 sps:$4 sm:$0xff]  }
 0x559   :  { %v1521_v33 = vpack.c.bf16 %v3288_v35, %v3288_v35 }
 0x55b   :  { %1555 = vmatmul.mubr.bf16.vlgmr.msra.gmra.mxu0 %v1521_v33  ;;  %1596 = vmatmul.mubr.bf16.vlgmr.msra.gmra.mxu1 %v1521_v33 }
 0x55c   :  { %1605 = vmatpush1.bf16.msra.mxu0 %v2452_v23  ;;  %2212 = vmatpush3.bf16.msra.mxu1 %v2453_v27 }
 0x55d   :  { %1606 = vmatprep.subr.bf16.mxu0 %v2454_v13  ;;  %2213 = vmatprep.subr.bf16.mxu1 %v3455_v61 }
 0x55e   :  { %1636 = vmatprep.mubr.bf16.mxu0 %v3448_v55  ;;  %2227 = vmatprep.mubr.msk.bf16.mxu1 %vm2570_vm5, %v3455_v61  ;;  %vm1696_vm5 = vmand %vm1498_vm4, %vm2945_vm8 }
 0x560   :  { %1607 = vmatpush1.bf16.msra.mxu0 %v2455_v0  ;;  %2214 = vmatpush3.bf16.msra.mxu1 %v2456_v37 }
 0x561   :  { %1608 = vmatprep.subr.bf16.mxu0 %v2457_v36  ;;  %2215 = vmatprep.subr.bf16.mxu1 %v3455_v61 }
 0x564   :  { %1609 = vmatpush1.bf16.msra.mxu0 %v2458_v49  ;;  %2216 = vmatpush3.bf16.msra.mxu1 %v2459_v42 }
 0x565   :  { %1610 = vmatprep.subr.bf16.mxu0 %v2460_v38  ;;  %2217 = vmatprep.subr.bf16.mxu1 %v3455_v61 }
 0x568   :  { %1611 = vmatpush1.bf16.msra.mxu0 %v2461_v31  ;;  %2218 = vmatpush3.bf16.msra.mxu1 %v2462_v51 }
 0x569   :  { %1612 = vmatprep.subr.bf16.mxu0 %v2463_v30  ;;  %2219 = vmatprep.subr.bf16.mxu1 %v3455_v61 }
 0x56c   :  { %1613 = vmatpush1.bf16.msra.mxu0 %v2464_v4  ;;  %2220 = vmatpush3.bf16.msra.mxu1 %v2465_v28 }
 0x56d   :  { %1614 = vmatprep.subr.bf16.mxu0 %v2466_v24  ;;  %2221 = vmatprep.subr.bf16.mxu1 %v3455_v61 }
 0x570   :  { %1615 = vmatpush1.bf16.msra.mxu0 %v2467_v26  ;;  %2222 = vmatpush3.bf16.msra.mxu1 %v2468_v32 }
 0x571   :  { %1616 = vmatprep.subr.bf16.mxu0 %v2469_v34  ;;  %2223 = vmatprep.subr.bf16.mxu1 %v3455_v61 }
 0x574   :  { %1617 = vmatpush1.bf16.msra.mxu0 %v2470_v40  ;;  %2224 = vmatpush3.bf16.msra.mxu1 %v2471_v10  ;;  %v2324_v40 = vld [vmem:[#allocation8 + $0x74] ss:$8 sps:$4 sm:$0xff]   ;;  %v2322_v10 = vld [vmem:[#allocation8 + $0x70] ss:$8 sps:$4 sm:$0xff]  }
 0x575   :  { %1618 = vmatprep.subr.bf16.mxu0 %v2472_v11  ;;  %2225 = vmatprep.subr.bf16.mxu1 %v3455_v61  ;;  %v2325_v11 = vld [vmem:[#allocation8 + $0x60] ss:$8 sps:$4 sm:$0xff]  }
 0x578   :  { %1619 = vmatpush1.bf16.msra.mxu0 %v2473_v12  ;;  %2226 = vmatpush3.bf16.msra.mxu1 %v2474_v14  ;;  %v2328_v12 = vld [vmem:[#allocation8 + $0x50] ss:$8 sps:$4 sm:$0xff]   ;;  %v2333_v14 = vld [vmem:[#allocation8 + $0x44] ss:$8 sps:$4 sm:$0xff]  }
 0x579   :  { %1726 = vmatprep.subr.bf16.mxu0 %v3170_v43  ;;  %1767 = vmatprep.subr.bf16.mxu1 %v3173_v62 }
 0x57b   :  { %1637 = vmatmul.mubr.bf16.vlgmr.msra.gmra.mxu0 %v1521_v33  ;;  %2228 = vmatmul.mubr.bf16.vlgmr.msra.gmra.mxu1 %v1521_v33  ;;  %v3508_v33 = vld [vmem:[#allocation45_spill] sm:$0xff] }
 0x57c   :  { %1727 = vmatpush1.bf16.msra.mxu0 %v3176_v58  ;;  %1768 = vmatpush1.bf16.msra.mxu1 %v3179_v57 }
 0x57d   :  { %1728 = vmatprep.subr.bf16.mxu0 %v3182_v54  ;;  %1769 = vmatprep.subr.bf16.mxu1 %v3185_v52 }
 0x57e   :  { %1758 = vmatprep.mubr.bf16.mxu0 %v3448_v55  ;;  %1799 = vmatprep.mubr.bf16.mxu1 %v3448_v55 }
 0x580   :  { %1729 = vmatpush1.bf16.msra.mxu0 %v3190_v60  ;;  %1770 = vmatpush1.bf16.msra.mxu1 %v3193_v1 }
 0x581   :  { %1730 = vmatprep.subr.bf16.mxu0 %v3196_v63  ;;  %1771 = vmatprep.subr.bf16.mxu1 %v3199_v2 }
 0x584   :  { %1731 = vmatpush1.bf16.msra.mxu0 %v3202_v5  ;;  %1772 = vmatpush1.bf16.msra.mxu1 %v3205_v6 }
 0x585   :  { %1732 = vmatprep.subr.bf16.mxu0 %v3208_v7  ;;  %1773 = vmatprep.subr.bf16.mxu1 %v3211_v8  ;;  %v3506_v7 = vld [vmem:[#allocation40_spill] sm:$0xff] }
 0x588   :  { %1733 = vmatpush1.bf16.msra.mxu0 %v3214_v9  ;;  %1774 = vmatpush1.bf16.msra.mxu1 %v3217_v44 }
 0x589   :  { %1734 = vmatprep.subr.bf16.mxu0 %v3220_v47  ;;  %1775 = vmatprep.subr.bf16.mxu1 %v3223_v48 }
 0x58c   :  { %1735 = vmatpush1.bf16.msra.mxu0 %v3226_v50  ;;  %1776 = vmatpush1.bf16.msra.mxu1 %v3229_v53 }
 0x58d   :  { %1736 = vmatprep.subr.bf16.mxu0 %v3232_v56  ;;  %1777 = vmatprep.subr.bf16.mxu1 %v3235_v59 }
 0x590   :  { %1737 = vmatpush1.bf16.msra.mxu0 %v3238_v29  ;;  %1778 = vmatpush1.bf16.msra.mxu1 %v3241_v3  ;;  %v3507_v3 = vld [vmem:[#allocation41_spill] sm:$0xff] }
 0x591   :  { %1738 = vmatprep.subr.bf16.mxu0 %v3244_v15  ;;  %1779 = vmatprep.subr.bf16.mxu1 %v3247_v16 }
 0x594   :  { %1739 = vmatpush1.bf16.msra.mxu0 %v3250_v17  ;;  %1780 = vmatpush1.bf16.msra.mxu1 %v3253_v18 }
 0x595   :  { %1740 = vmatprep.subr.bf16.mxu0 %v3256_v19  ;;  %1781 = vmatprep.subr.bf16.mxu1 %v3259_v20 }
 0x598   :  { %1741 = vmatpush1.bf16.msra.mxu0 %v3262_v21  ;;  %1782 = vmatpush1.bf16.msra.mxu1 %v3265_v41 }
 0x599   :  { %1922 = vmatprep.subr.bf16.mxu0 %v2324_v40 }
 0x61b   :  { %v1556_v61 = vpop.f32.mrf.mxu0  ;;  %v1597_v43 = vpop.f32.mrf.mxu1 }
 0x61c   :  { %v1685_v1 = vmul.f32 0.5, %v1556_v61  ;;  %v2331_v61 = vld [vmem:[#allocation8 + $0x40] ss:$8 sps:$4 sm:$0xff]  }
 0x61d   :  { %v1558_v62 = vpop.f32.mrf.mxu0  ;;  %v1599_v58 = vpop.f32.mrf.mxu1 }
 0x61e   :  { %2400 = vtanh.f32 %v1685_v1  ;;  %v1686_v9 = vmul.f32 0.5, %v1558_v62  ;;  %v2334_v62 = vld [vmem:[#allocation8 + $0x30] ss:$8 sps:$4 sm:$0xff]  }
 0x61f   :  { %v1560_v57 = vpop.f32.mrf.mxu0  ;;  %v1601_v54 = vpop.f32.mrf.mxu1 }
 0x620   :  { %v2342_v57 = vld [vmem:[#allocation8 + $0x14] ss:$8 sps:$4 sm:$0xff]   ;;  %v2340_v54 = vld [vmem:[#allocation8 + $0x10] ss:$8 sps:$4 sm:$0xff]  }
 0x621   :  { %v1561_v52 = vpop.f32.mrf.mxu0  ;;  %v1602_v60 = vpop.f32.mrf.mxu1 }
 0x622   :  { %v2345_v52 = vld [vmem:[#allocation8 + $0x4] ss:$8 sps:$4 sm:$0xff]   ;;  %v2343_v60 = vld [vmem:[#allocation8] ss:$8 sps:$4 sm:$0xff]  }
 0x62b   :  { %v2401_v63 = vpop.eup %2400 }
 0x62c   :  { %v1689_v2 = vmul.f32 0.5, %v2401_v63 }
 0x62e   :  { %v1691_v50 = vadd.f32 0.5, %v1689_v2 }
 0x630   :  { %v1693_v16 = vmul.f32 %v1691_v50, %v1599_v58  ;;  %v2337_v58 = vld [vmem:[#allocation8 + $0x20] ss:$8 sps:$4 sm:$0xff]  }
 0x632   :  { %v1694_v18 = vadd.f32 %v1693_v16, %v1597_v43  ;;  %v2336_v43 = vld [vmem:[#allocation8 + $0x34] ss:$8 sps:$4 sm:$0xff]  }
 0x63b   :  { %v1638_v5 = vpop.f32.mrf.mxu0  ;;  %v1679_v6 = vpop.f32.mrf.mxu1 }
 0x63c   :  { %v1706_v8 = vadd.f32 %v1638_v5, %v3506_v7 }
 0x63d   :  { %v1640_v44 = vpop.f32.mrf.mxu0  ;;  %v2229_v47 = vpop.f32.mrf.mxu1 }
 0x63e   :  { %v1708_v48 = vmul.f32 0.5, %v1706_v8  ;;  %v1707_v15 = vadd.f32 %v1640_v44, %v3507_v3 }
 0x63f   :  { %v1642_v53 = vpop.f32.mrf.mxu0  ;;  %v1682_v56 = vpop.f32.mrf.mxu1 }
 0x640   :  { %2402 = vtanh.f32 %v1708_v48  ;;  %v1709_v17 = vmul.f32 0.5, %v1707_v15 }
 0x641   :  { %2404 = vtanh.f32 %v1686_v9  ;;  %v1643_v59 = vpop.f32.mrf.mxu0  ;;  %v2230_v29 = vpop.f32.mrf.mxu1 }
 0x642   :  { %2406 = vtanh.f32 %v1709_v17 }
 0x643   :  { %2408 = vtanh.f32 %v1694_v18 }
 0x64d   :  { %v2403_v19 = vpop.eup %2402 }
 0x64e   :  { %v2405_v20 = vpop.eup %2404  ;;  %v1712_v21 = vmul.f32 0.5, %v2403_v19 }
 0x64f   :  { %v1690_v25 = vmul.f32 0.5, %v2405_v20  ;;  %v2407_v13 = vpop.eup %2406 }
 0x650   :  { %v1714_v41 = vadd.f32 0.5, %v1712_v21  ;;  %v2409_v0 = vpop.eup %2408  ;;  %v1713_v36 = vmul.f32 0.5, %v2407_v13 }
 0x651   :  { %v1692_v27 = vadd.f32 0.5, %v1690_v25 }
 0x652   :  { %v1716_v46 = vmul.f32 %v1714_v41, %v1679_v6  ;;  %v1715_v38 = vadd.f32 0.5, %v1713_v36 }
 0x653   :  { %v1697_v37 = vsub.f32 1.0, %v1692_v27  ;;  %v1699_v42 = vmul.f32 %v1692_v27, %v3288_v35 }
 0x654   :  { %v1717_v23 = vadd.f32 %v3508_v33, %v1716_v46  ;;  %v1720_v51 = vsub.f32 1.0, %v1715_v38 }
 0x655   :  { %v1698_v49 = vmul.f32 %v2409_v0, %v1697_v37 }
 0x656   :  { %2410 = vtanh.f32 %v1717_v23 }
 0x657   :  { %v1700_v31 = vadd.f32 %v1699_v42, %v1698_v49 }
 0x659   :  { %v1701_v4 = vsel %vm1696_vm5, %v1700_v31, %v3288_v35  ;;  %v2327_v35 = vld [vmem:[#allocation8 + $0x64] ss:$8 sps:$4 sm:$0xff]  }
 0x65a   :  { %v1722_v24 = vmul.f32 %v1715_v38, %v1701_v4 }
 0x663   :  { %v2411_v30 = vpop.eup %2410 }
 0x664   :  { %v1721_v28 = vmul.f32 %v2411_v30, %v1720_v51 }
 0x666   :  { %v1723_v26 = vadd.f32 %v1722_v24, %v1721_v28 }
 0x668   :  { %v3350_v32 = vsel %vm1719_vm9, %v1723_v26, %v1701_v4 }
 0x669   :  { %v1725_v34 = vpack.c.bf16 %v3350_v32, %v3350_v32 }
 0x66b   :  { %1759 = vmatmul.mubr.bf16.vlgmr.msra.gmra.mxu0 %v1725_v34  ;;  %1800 = vmatmul.mubr.bf16.vlgmr.msra.gmra.mxu1 %v1725_v34 }
 0x66c   :  { %1954 = vmatprep.mubr.bf16.mxu0 %v3448_v55  ;;  %1923 = vmatpush1.bf16.msra.mxu0 %v2322_v10  ;;  %v2339_v55 = vld [vmem:[#allocation8 + $0x24] ss:$8 sps:$4 sm:$0xff]  }
 0x66d   :  { %1924 = vmatprep.subr.bf16.mxu0 %v2327_v35 }
 0x670   :  { %1925 = vmatpush1.bf16.msra.mxu0 %v2325_v11 }
 0x671   :  { %1926 = vmatprep.subr.bf16.mxu0 %v2330_v45 }
 0x674   :  { %1927 = vmatpush1.bf16.msra.mxu0 %v2328_v12 }
 0x675   :  { %1928 = vmatprep.subr.bf16.mxu0 %v2333_v14 }
 0x678   :  { %1929 = vmatpush1.bf16.msra.mxu0 %v2331_v61 }
 0x679   :  { %1930 = vmatprep.subr.bf16.mxu0 %v2336_v43 }
 0x67c   :  { %1931 = vmatpush1.bf16.msra.mxu0 %v2334_v62 }
 0x67d   :  { %1932 = vmatprep.subr.bf16.mxu0 %v2339_v55 }
 0x680   :  { %1933 = vmatpush1.bf16.msra.mxu0 %v2337_v58 }
 0x681   :  { %1934 = vmatprep.subr.bf16.mxu0 %v2342_v57 }
 0x684   :  { %1935 = vmatpush1.bf16.msra.mxu0 %v2340_v54 }
 0x685   :  { %1936 = vmatprep.subr.bf16.mxu0 %v2345_v52 }
 0x688   :  { %1937 = vmatpush1.bf16.msra.mxu0 %v2343_v60 }
 0x72b   :  { %v1760_v1 = vpop.f32.mrf.mxu0  ;;  %v1801_v63 = vpop.f32.mrf.mxu1 }
 0x72c   :  { %v1808_v2 = vmul.f32 0.5, %v1760_v1 }
 0x72d   :  { %v1762_v5 = vpop.f32.mrf.mxu0  ;;  %v1803_v6 = vpop.f32.mrf.mxu1 }
 0x72e   :  { %2412 = vtanh.f32 %v1808_v2  ;;  %v1809_v47 = vmul.f32 0.5, %v1762_v5 }
 0x72f   :  { %v1764_v7 = vpop.f32.mrf.mxu0  ;;  %v1805_v8 = vpop.f32.mrf.mxu1 }
 0x730   :  { %2414 = vtanh.f32 %v1809_v47 }
 0x731   :  { %v1765_v9 = vpop.f32.mrf.mxu0  ;;  %v1806_v44 = vpop.f32.mrf.mxu1 }
 0x73b   :  { %v2413_v48 = vpop.eup %2412 }
 0x73c   :  { %v1812_v50 = vmul.f32 0.5, %v2413_v48 }
 0x73d   :  { %v2415_v29 = vpop.eup %2414 }
 0x73e   :  { %v1814_v53 = vadd.f32 0.5, %v1812_v50  ;;  %v1813_v3 = vmul.f32 0.5, %v2415_v29 }
 0x740   :  { %v1816_v56 = vmul.f32 %v1814_v53, %v1803_v6  ;;  %v1815_v15 = vadd.f32 0.5, %v1813_v3 }
 0x742   :  { %v1817_v59 = vadd.f32 %v1816_v56, %v1801_v63  ;;  %v1820_v16 = vsub.f32 1.0, %v1815_v15  ;;  %v1822_v18 = vmul.f32 %v1815_v15, %v3350_v32 }
 0x744   :  { %2416 = vtanh.f32 %v1817_v59 }
 0x751   :  { %v2417_v17 = vpop.eup %2416 }
 0x752   :  { %v1821_v19 = vmul.f32 %v2417_v17, %v1820_v16 }
 0x754   :  { %v1823_v20 = vadd.f32 %v1822_v18, %v1821_v19 }
 0x756   :  { %v1824_v21 = vsel %vm1819_vm2, %v1823_v20, %v3350_v32 }
 0x757   :  { %v1825_v41 = vpack.c.bf16 %v1824_v21, %v1824_v21 }
 0x759   :  { %1955 = vmatmul.mubr.bf16.vlgmr.msra.gmra.mxu0 %v1825_v41 }
 0x819   :  { %v1956_v25 = vpop.f32.mrf.mxu0 }
 0x81a   :  { %1963 = vst [vmem:[#allocation9] sm:$0xff] %v1956_v25 }
 0x81b   :  { %v1958_v46 = vpop.f32.mrf.mxu0 }
 0x81c   :  { %1964 = vst [vmem:[#allocation9 + $0x8] sm:$0xff] %v1958_v46 }
 0x81d   :  { %v1960_v33 = vpop.f32.mrf.mxu0 }
 0x81e   :  { %2546 = shalt.err (!%p2543_p5)
}
 0x81f   :  { %1974 = dma.vmem_to_hbm [thread:$0]  %s1972_s18, 256, %s3371_s7, [#allocation5]   ;;  %v1961_v39 = vpop.f32.mrf.mxu0 }
 0x820   :  { %2559 = dma.done.wait [#allocation5], 256  }
 0x821   :  { %2560 = vsyncadd [#allocation5], 4294967040 }
 0x822   :  { %1978 = vsyncpa [#allocation4], 1 }
 0x823   :  { %1979 = vsyncpa [#allocation7], 1 }
 0x824   :  { %1980 = vsyncpa [#allocation5], 1 }

</bundles_post_ra>
